<compile_context>
chip_gen: v6e
topology: v6e:2x2x1
jax: 0.10.0
libtpu: 0.0.40
codegen_flags: <defaults>
</compile_context>

<pallas_src>
import functools

import jax
import jax.numpy as jnp
from jax.experimental import pallas as pl
from jax.experimental.pallas import tpu as pltpu


def _round_up(x, m):
    return (x + m - 1) // m * m


def _group_conv_kernel(x_ref, w_ref, b_ref, gamma_ref, beta_ref, mask_ref, ind_ref, indt_ref,
                       o_ref, xcol_ref, stats_ref, gcomb_ref, *,
                       KH, KW, Wp, Cp_in, G, Cg_out, Nb, Lp, cnt,
                       act_norm, negative_slope, eps):
    """One batch-block (Nb samples) per grid step.

    x_ref     : (Nb, Cp_in, F)        flat zero-padded input (channels padded to Cp_in), compute dtype
    w_ref     : (C_out, KT*Cp_in)     block-diagonal (over groups), tap-major weights, compute dtype
    b/gamma/beta refs : (C_out, 1)    f32
    mask_ref  : (1, Nb*Lp)            f32 validity mask (wrap + lane-pad columns zeroed), constant
    ind_ref   : (G, C_out) f32        group-indicator;  indt_ref : (C_out, G) f32
    o_ref     : (Nb, C_out, Lp)       f32, lane-dense (junk columns stripped outside)
    xcol_ref  : (KT*Cp_in, Nb*Lp)     VMEM im2col scratch, compute dtype
    stats_ref : (C_out, 2*Nb) f32     [per-sample sums | per-sample sum-of-squares]
    gcomb_ref : (G, 2*Nb) f32         [per-sample group means | per-sample group rsqrt(var+eps)]
    """
    KT = KH * KW
    C_out = G * Cg_out

    # --- im2col-lite: each tap is a plain static lane-offset window of the flat input.
    #     Every (Cp_in-aligned) scratch row and every lane column is rewritten each step.
    for s in range(Nb):
        base = s * Lp
        for kh in range(KH):
            for kw in range(KW):
                t = kh * KW + kw
                d = kh * Wp + kw
                xcol_ref[t * Cp_in:(t + 1) * Cp_in, base:base + Lp] = x_ref[s, :, d:d + Lp]

    # --- single fused MXU matmul over (taps x padded-channels) x (samples x spatial), f32 acc
    y = jnp.dot(w_ref[...], xcol_ref[...], preferred_element_type=jnp.float32)  # (C_out, Nb*Lp)
    y = y + b_ref[...]                                                           # + (C_out, 1)

    if act_norm:
        mask = mask_ref[...]                       # (1, Nb*Lp) f32, hoisted constant
        ym = y * mask

        # Per-sample one-pass statistics (f32): lane reductions into a tiny stats matrix.
        for s in range(Nb):
            ys = ym[:, s * Lp:(s + 1) * Lp]
            stats_ref[:, s:s + 1] = jnp.sum(ys, axis=1, keepdims=True)
            stats_ref[:, Nb + s:Nb + s + 1] = jnp.sum(ys * ys, axis=1, keepdims=True)

        # Fused group aggregation: ONE dot for [sum | sumsq] of all samples.
        gstats = jnp.dot(ind_ref[...], stats_ref[...],
                         preferred_element_type=jnp.float32) * (1.0 / cnt)      # (G, 2*Nb)
        gmean = gstats[:, :Nb]                                                   # (G, Nb)
        ginv = jax.lax.rsqrt(gstats[:, Nb:] - gmean * gmean + eps)               # (G, Nb), EUP
        gcomb_ref[:, :Nb] = gmean
        gcomb_ref[:, Nb:] = ginv

        # ONE dot to broadcast [mean | inv-std] back to channels.
        ch = jnp.dot(indt_ref[...], gcomb_ref[...],
                     preferred_element_type=jnp.float32)                         # (C_out, 2*Nb)

        gb = gamma_ref[...]
        bb = beta_ref[...]
        for s in range(Nb):
            mu = ch[:, s:s + 1]
            inv = ch[:, Nb + s:Nb + s + 1]
            ys = (y[:, s * Lp:(s + 1) * Lp] - mu) * (inv * gb) + bb
            ys = jnp.where(ys > 0, ys, negative_slope * ys)                      # LeakyReLU(0.2)
            o_ref[s, :, :] = ys.astype(o_ref.dtype)
    else:
        for s in range(Nb):
            o_ref[s, :, :] = y[:, s * Lp:(s + 1) * Lp].astype(o_ref.dtype)


class GroupConv2d:
    """JAX/Pallas port of the PyTorch GroupConv2d module (forward pass)."""

    def __init__(self, in_channels, out_channels, kernel_size=3, stride=1, padding=0,
                 groups=1, act_norm=False, *, key, compute_dtype=jnp.bfloat16):
        if in_channels % groups != 0:
            groups = 1
        assert out_channels % groups == 0, "out_channels must be divisible by groups"
        assert stride == 1  # TODO(synk): stride > 1 not implemented (module default is stride=1)

        self.in_channels = in_channels
        self.out_channels = out_channels
        self.KH = self.KW = kernel_size
        self.stride = stride
        self.padding = padding
        self.groups = groups
        self.act_norm = act_norm
        self.negative_slope = 0.2
        self.eps = 1e-5
        self.compute_dtype = compute_dtype

        # Sublane-aligned per-tap channel stride (16 for 2-byte dtypes, 8 for f32).
        sub = 16 if jnp.dtype(compute_dtype).itemsize == 2 else 8
        self.Cp_in = _round_up(in_channels, sub)

        cg_in = in_channels // groups
        cg_out = out_channels // groups
        bound = (1.0 / (cg_in * self.KH * self.KW)) ** 0.5   # PyTorch Conv2d default init bound
        kw_, kb_ = jax.random.split(key)
        # PyTorch weight layout: (C_out, Cg_in, KH, KW)
        self.weight = jax.random.uniform(
            kw_, (out_channels, cg_in, self.KH, self.KW), jnp.float32, -bound, bound)
        self.bias = jax.random.uniform(kb_, (out_channels,), jnp.float32, -bound, bound)
        # GroupNorm affine params (default: gamma=1, beta=0)
        self.gamma = jnp.ones((out_channels,), jnp.float32)
        self.beta = jnp.zeros((out_channels,), jnp.float32)

        # Fused weight: block-diagonal over groups, tap-major, channel stride padded to Cp_in:
        #   w_full[co, t*Cp_in + ci] = weight[co, ci - g*Cg_in, kh, kw] if ci in co's group else 0
        # TODO(synk): for large G this multiplies mostly zeros — switch to a per-group loop.
        KT = self.KH * self.KW
        wg = self.weight.reshape(groups, cg_out, cg_in, self.KH, self.KW)
        wg = wg.transpose(0, 1, 3, 4, 2).reshape(groups, cg_out, KT, cg_in)   # (G,Cg_out,KT,Cg_in)
        eye = jnp.eye(groups, dtype=jnp.float32)
        wbd = jnp.einsum('gokc,gh->gokhc', wg, eye)                           # (G,Cg_out,KT,G,Cg_in)
        wfull = wbd.reshape(out_channels, KT, in_channels)
        wfull = jnp.pad(wfull, ((0, 0), (0, 0), (0, self.Cp_in - in_channels)))
        self.w_full = wfull.reshape(out_channels, KT * self.Cp_in).astype(compute_dtype)

        # Hoisted group-indicator matrices (constants).
        gidx = jnp.arange(out_channels) // cg_out
        self.ind = (jnp.arange(groups)[:, None] == gidx[None, :]).astype(jnp.float32)   # (G, C_out)
        self.ind_t = (gidx[:, None] == jnp.arange(groups)[None, :]).astype(jnp.float32) # (C_out, G)

    def __call__(self, x):
        # x: NCHW float32
        N, C_in, H, W = x.shape
        assert C_in == self.in_channels
        p, KH, KW = self.padding, self.KH, self.KW
        G = self.groups
        C_out = self.out_channels
        Cp_in = self.Cp_in
        cdt = self.compute_dtype
        cbytes = jnp.dtype(cdt).itemsize

        Hp, Wp = H + 2 * p, W + 2 * p
        H_out, W_out = Hp - KH + 1, Wp - KW + 1
        L = H_out * Wp                         # flattened valid+wrap length per sample
        Lp = _round_up(L, 128)                 # lane-dense per-sample width
        F = (KH - 1) * Wp + (KW - 1) + Lp      # flat input length so every tap window fits
        KT = KH * KW
        KTC = KT * Cp_in

        # --- batch block size from a crude per-step VMEM budget (capped to bound unrolling) ---
        per_sample = (2 * Cp_in * F * cbytes        # input block (double-buffered)
                      + 2 * C_out * Lp * 4          # output block (double-buffered)
                      + KTC * Lp * cbytes           # im2col scratch slice
                      + 4 * C_out * Lp * 4)         # y / epilogue temporaries (rough)
        budget = 24 << 20
        Nb = max(1, min(N, 8, budget // max(per_sample, 1)))
        while N % Nb:
            Nb -= 1

        # --- wrapper-side prep: channel pad to Cp_in, spatial pad, flatten, tail pad, cast ---
        # TODO(synk): move the halo construction in-kernel to save these HBM passes.
        xp = jnp.pad(x, ((0, 0), (0, Cp_in - C_in), (p, p), (p, p)))
        xf = xp.reshape(N, Cp_in, Hp * Wp)
        xf = jnp.pad(xf, ((0, 0), (0, 0), (0, F - Hp * Wp))).astype(cdt)

        # Hoisted validity mask: wrap columns (w >= W_out) and lane-pad columns (j >= L) -> 0.
        col = jnp.arange(Lp, dtype=jnp.int32)
        valid = ((col % Wp) < W_out) & (col < L)
        mask = jnp.tile(valid.astype(jnp.float32), (Nb,)).reshape(1, Nb * Lp)

        b2 = self.bias.reshape(C_out, 1)
        g2 = self.gamma.reshape(C_out, 1)
        t2 = self.beta.reshape(C_out, 1)

        kernel = functools.partial(
            _group_conv_kernel, KH=KH, KW=KW, Wp=Wp, Cp_in=Cp_in,
            G=G, Cg_out=C_out // G, Nb=Nb, Lp=Lp,
            cnt=float((C_out // G) * H_out * W_out),
            act_norm=self.act_norm, negative_slope=self.negative_slope, eps=self.eps)

        w_bytes = C_out * KTC * cbytes
        est = Nb * per_sample + 2 * w_bytes + (1 << 20)
        vmem_limit = int(min(max(2 * est, 32 << 20), 96 << 20))

        out = pl.pallas_call(
            kernel,
            out_shape=jax.ShapeDtypeStruct((N, C_out, Lp), jnp.float32),
            grid_spec=pltpu.PrefetchScalarGridSpec(
                num_scalar_prefetch=0,
                grid=(N // Nb,),
                in_specs=[
                    pl.BlockSpec((Nb, Cp_in, F), lambda n: (n, 0, 0)),
                    pl.BlockSpec((C_out, KTC), lambda n: (0, 0)),
                    pl.BlockSpec((C_out, 1), lambda n: (0, 0)),
                    pl.BlockSpec((C_out, 1), lambda n: (0, 0)),
                    pl.BlockSpec((C_out, 1), lambda n: (0, 0)),
                    pl.BlockSpec((1, Nb * Lp), lambda n: (0, 0)),
                    pl.BlockSpec((G, C_out), lambda n: (0, 0)),
                    pl.BlockSpec((C_out, G), lambda n: (0, 0)),
                ],
                out_specs=pl.BlockSpec((Nb, C_out, Lp), lambda n: (n, 0, 0)),
                scratch_shapes=[
                    pltpu.VMEM((KTC, Nb * Lp), cdt),          # im2col
                    pltpu.VMEM((C_out, 2 * Nb), jnp.float32),  # [sum | sumsq]
                    pltpu.VMEM((G, 2 * Nb), jnp.float32),      # [mean | rsqrt(var+eps)]
                ],
            ),
            compiler_params=pltpu.CompilerParams(
                dimension_semantics=("parallel",),
                vmem_limit_bytes=vmem_limit),
        )(xf, self.w_full, b2, g2, t2, mask, self.ind, self.ind_t)

        # (N, C_out, Lp) -> drop lane pad -> (H_out, Wp) -> strip the (KW-1) wrap cols -> NCHW.
        return out[:, :, :L].reshape(N, C_out, H_out, Wp)[:, :, :, :W_out]


def _reference(x, weight, bias, gamma, beta, groups, padding, act_norm,
               eps=1e-5, slope=0.2):
    """Plain-JAX reference matching PyTorch semantics."""
    y = jax.lax.conv_general_dilated(
        x, weight, window_strides=(1, 1), padding=[(padding, padding)] * 2,
        feature_group_count=groups,
        dimension_numbers=("NCHW", "OIHW", "NCHW"),
        precision=jax.lax.Precision.HIGHEST)
    y = y + bias.reshape(1, -1, 1, 1)
    if act_norm:
        N, C, H, W = y.shape
        yg = y.reshape(N, groups, -1)
        mean = yg.mean(-1, keepdims=True)
        var = ((yg - mean) ** 2).mean(-1, keepdims=True)
        yg = (yg - mean) / jnp.sqrt(var + eps)
        y = yg.reshape(N, C, H, W) * gamma.reshape(1, -1, 1, 1) + beta.reshape(1, -1, 1, 1)
        y = jnp.where(y > 0, y, slope * y)
    return y


def _qdq(a, dtype):
    """Quantize-dequantize so the reference sees the same bf16 operands as the kernel."""
    return a.astype(dtype).astype(jnp.float32)


if __name__ == "__main__":
    key = jax.random.PRNGKey(0)
    kx, kp1, kp2 = jax.random.split(key, 3)

    # Small shapes consistent with the module: N=2, C_in=4, H=W=16.
    x = jax.random.normal(kx, (2, 4, 16, 16), jnp.float32)

    # Case 1: grouped conv + GroupNorm + LeakyReLU.
    m1 = GroupConv2d(4, 8, kernel_size=3, stride=1, padding=1, groups=2,
                     act_norm=True, key=kp1)
    y1 = jax.block_until_ready(m1(x))
    r1 = _reference(_qdq(x, m1.compute_dtype), _qdq(m1.weight, m1.compute_dtype),
                    m1.bias, m1.gamma, m1.beta, m1.groups, m1.padding, True)
    assert y1.shape == (2, 8, 16, 16)
    assert jnp.allclose(y1, r1, atol=2e-2, rtol=2e-2), float(jnp.max(jnp.abs(y1 - r1)))

    # Case 2: plain conv path (act_norm=False), groups fallback (3 does not divide 4 -> groups=1).
    m2 = GroupConv2d(4, 6, kernel_size=3, stride=1, padding=0, groups=3,
                     act_norm=False, key=kp2)
    y2 = jax.block_until_ready(m2(x))
    r2 = _reference(_qdq(x, m2.compute_dtype), _qdq(m2.weight, m2.compute_dtype),
                    m2.bias, m2.gamma, m2.beta, m2.groups, m2.padding, False)
    assert y2.shape == (2, 6, 14, 14)
    assert jnp.allclose(y2, r2, atol=2e-2, rtol=2e-2), float(jnp.max(jnp.abs(y2 - r2)))

    print("KERNEL_OK")
</pallas_src>

<mosaic_0001>
module attributes {stable_mosaic.version = 11 : i64} {
  func.func @_group_conv_kernel(%arg0: i32, %arg1: memref<2x16x422xbf16, #tpu.memory_space<vmem>>, %arg2: memref<8x144xbf16, #tpu.memory_space<vmem>>, %arg3: memref<8x1xf32, #tpu.memory_space<vmem>>, %arg4: memref<8x1xf32, #tpu.memory_space<vmem>>, %arg5: memref<8x1xf32, #tpu.memory_space<vmem>>, %arg6: memref<1x768xf32, #tpu.memory_space<vmem>>, %arg7: memref<2x8xf32, #tpu.memory_space<vmem>>, %arg8: memref<8x2xf32, #tpu.memory_space<vmem>>, %arg9: memref<2x8x384xf32, #tpu.memory_space<vmem>>, %arg10: memref<144x768xbf16, #tpu.memory_space<vmem>>, %arg11: memref<8x4xf32, #tpu.memory_space<vmem>>, %arg12: memref<2x4xf32, #tpu.memory_space<vmem>>) attributes {dimension_semantics = [#tpu.dimension_semantics<parallel>], iteration_bounds = array<i64: 1>, scalar_prefetch = 0 : i64, scratch_operands = 3 : i64, tpu.core_type = #tpu.core_type<tc>, window_params = [{transform_indices = @transform_0, window_bounds = array<i64: 2, 16, 422>}, {pipeline_mode = #tpu.pipeline_mode<synchronous>, transform_indices = @transform_1, window_bounds = array<i64: 8, 144>}, {pipeline_mode = #tpu.pipeline_mode<synchronous>, transform_indices = @transform_2, window_bounds = array<i64: 8, 1>}, {pipeline_mode = #tpu.pipeline_mode<synchronous>, transform_indices = @transform_3, window_bounds = array<i64: 8, 1>}, {pipeline_mode = #tpu.pipeline_mode<synchronous>, transform_indices = @transform_4, window_bounds = array<i64: 8, 1>}, {pipeline_mode = #tpu.pipeline_mode<synchronous>, transform_indices = @transform_5, window_bounds = array<i64: 1, 768>}, {pipeline_mode = #tpu.pipeline_mode<synchronous>, transform_indices = @transform_6, window_bounds = array<i64: 2, 8>}, {pipeline_mode = #tpu.pipeline_mode<synchronous>, transform_indices = @transform_7, window_bounds = array<i64: 8, 2>}, {transform_indices = @transform_8, window_bounds = array<i64: 2, 8, 384>}]} {
    %c0 = arith.constant 0 : index
    %c0_0 = arith.constant 0 : index
    %c0_1 = arith.constant 0 : index
    %0 = vector.load %arg1[%c0, %c0_0, %c0_1] : memref<2x16x422xbf16, #tpu.memory_space<vmem>>, vector<1x16x384xbf16>
    %1 = vector.shape_cast %0 : vector<1x16x384xbf16> to vector<16x384xbf16>
    %c0_2 = arith.constant 0 : index
    %c0_3 = arith.constant 0 : index
    %2 = vector.load %arg10[%c0_2, %c0_3] : memref<144x768xbf16, #tpu.memory_space<vmem>>, vector<16x384xbf16>
    tpu.vector_store %arg10[%c0_2, %c0_3], %1 {strides = array<i32>} : memref<144x768xbf16, #tpu.memory_space<vmem>>, vector<16x384xbf16>,
    %c0_4 = arith.constant 0 : index
    %c0_5 = arith.constant 0 : index
    %c1 = arith.constant 1 : index
    %3 = vector.load %arg1[%c0_4, %c0_5, %c1] : memref<2x16x422xbf16, #tpu.memory_space<vmem>>, vector<1x16x384xbf16>
    %4 = vector.shape_cast %3 : vector<1x16x384xbf16> to vector<16x384xbf16>
    %c16 = arith.constant 16 : index
    %c0_6 = arith.constant 0 : index
    %5 = vector.load %arg10[%c16, %c0_6] : memref<144x768xbf16, #tpu.memory_space<vmem>>, vector<16x384xbf16>
    tpu.vector_store %arg10[%c16, %c0_6], %4 {strides = array<i32>} : memref<144x768xbf16, #tpu.memory_space<vmem>>, vector<16x384xbf16>,
    %c0_7 = arith.constant 0 : index
    %c0_8 = arith.constant 0 : index
    %c2 = arith.constant 2 : index
    %6 = vector.load %arg1[%c0_7, %c0_8, %c2] : memref<2x16x422xbf16, #tpu.memory_space<vmem>>, vector<1x16x384xbf16>
    %7 = vector.shape_cast %6 : vector<1x16x384xbf16> to vector<16x384xbf16>
    %c32 = arith.constant 32 : index
    %c0_9 = arith.constant 0 : index
    %8 = vector.load %arg10[%c32, %c0_9] : memref<144x768xbf16, #tpu.memory_space<vmem>>, vector<16x384xbf16>
    tpu.vector_store %arg10[%c32, %c0_9], %7 {strides = array<i32>} : memref<144x768xbf16, #tpu.memory_space<vmem>>, vector<16x384xbf16>,
    %c0_10 = arith.constant 0 : index
    %c0_11 = arith.constant 0 : index
    %c18 = arith.constant 18 : index
    %9 = vector.load %arg1[%c0_10, %c0_11, %c18] : memref<2x16x422xbf16, #tpu.memory_space<vmem>>, vector<1x16x384xbf16>
    %10 = vector.shape_cast %9 : vector<1x16x384xbf16> to vector<16x384xbf16>
    %c48 = arith.constant 48 : index
    %c0_12 = arith.constant 0 : index
    %11 = vector.load %arg10[%c48, %c0_12] : memref<144x768xbf16, #tpu.memory_space<vmem>>, vector<16x384xbf16>
    tpu.vector_store %arg10[%c48, %c0_12], %10 {strides = array<i32>} : memref<144x768xbf16, #tpu.memory_space<vmem>>, vector<16x384xbf16>,
    %c0_13 = arith.constant 0 : index
    %c0_14 = arith.constant 0 : index
    %c19 = arith.constant 19 : index
    %12 = vector.load %arg1[%c0_13, %c0_14, %c19] : memref<2x16x422xbf16, #tpu.memory_space<vmem>>, vector<1x16x384xbf16>
    %13 = vector.shape_cast %12 : vector<1x16x384xbf16> to vector<16x384xbf16>
    %c64 = arith.constant 64 : index
    %c0_15 = arith.constant 0 : index
    %14 = vector.load %arg10[%c64, %c0_15] : memref<144x768xbf16, #tpu.memory_space<vmem>>, vector<16x384xbf16>
    tpu.vector_store %arg10[%c64, %c0_15], %13 {strides = array<i32>} : memref<144x768xbf16, #tpu.memory_space<vmem>>, vector<16x384xbf16>,
    %c0_16 = arith.constant 0 : index
    %c0_17 = arith.constant 0 : index
    %c20 = arith.constant 20 : index
    %15 = vector.load %arg1[%c0_16, %c0_17, %c20] : memref<2x16x422xbf16, #tpu.memory_space<vmem>>, vector<1x16x384xbf16>
    %16 = vector.shape_cast %15 : vector<1x16x384xbf16> to vector<16x384xbf16>
    %c80 = arith.constant 80 : index
    %c0_18 = arith.constant 0 : index
    %17 = vector.load %arg10[%c80, %c0_18] : memref<144x768xbf16, #tpu.memory_space<vmem>>, vector<16x384xbf16>
    tpu.vector_store %arg10[%c80, %c0_18], %16 {strides = array<i32>} : memref<144x768xbf16, #tpu.memory_space<vmem>>, vector<16x384xbf16>,
    %c0_19 = arith.constant 0 : index
    %c0_20 = arith.constant 0 : index
    %c36 = arith.constant 36 : index
    %18 = vector.load %arg1[%c0_19, %c0_20, %c36] : memref<2x16x422xbf16, #tpu.memory_space<vmem>>, vector<1x16x384xbf16>
    %19 = vector.shape_cast %18 : vector<1x16x384xbf16> to vector<16x384xbf16>
    %c96 = arith.constant 96 : index
    %c0_21 = arith.constant 0 : index
    %20 = vector.load %arg10[%c96, %c0_21] : memref<144x768xbf16, #tpu.memory_space<vmem>>, vector<16x384xbf16>
    tpu.vector_store %arg10[%c96, %c0_21], %19 {strides = array<i32>} : memref<144x768xbf16, #tpu.memory_space<vmem>>, vector<16x384xbf16>,
    %c0_22 = arith.constant 0 : index
    %c0_23 = arith.constant 0 : index
    %c37 = arith.constant 37 : index
    %21 = vector.load %arg1[%c0_22, %c0_23, %c37] : memref<2x16x422xbf16, #tpu.memory_space<vmem>>, vector<1x16x384xbf16>
    %22 = vector.shape_cast %21 : vector<1x16x384xbf16> to vector<16x384xbf16>
    %c112 = arith.constant 112 : index
    %c0_24 = arith.constant 0 : index
    %23 = vector.load %arg10[%c112, %c0_24] : memref<144x768xbf16, #tpu.memory_space<vmem>>, vector<16x384xbf16>
    tpu.vector_store %arg10[%c112, %c0_24], %22 {strides = array<i32>} : memref<144x768xbf16, #tpu.memory_space<vmem>>, vector<16x384xbf16>,
    %c0_25 = arith.constant 0 : index
    %c0_26 = arith.constant 0 : index
    %c38 = arith.constant 38 : index
    %24 = vector.load %arg1[%c0_25, %c0_26, %c38] : memref<2x16x422xbf16, #tpu.memory_space<vmem>>, vector<1x16x384xbf16>
    %25 = vector.shape_cast %24 : vector<1x16x384xbf16> to vector<16x384xbf16>
    %c128 = arith.constant 128 : index
    %c0_27 = arith.constant 0 : index
    %26 = vector.load %arg10[%c128, %c0_27] : memref<144x768xbf16, #tpu.memory_space<vmem>>, vector<16x384xbf16>
    tpu.vector_store %arg10[%c128, %c0_27], %25 {strides = array<i32>} : memref<144x768xbf16, #tpu.memory_space<vmem>>, vector<16x384xbf16>,
    %c1_28 = arith.constant 1 : index
    %c0_29 = arith.constant 0 : index
    %c0_30 = arith.constant 0 : index
    %27 = vector.load %arg1[%c1_28, %c0_29, %c0_30] : memref<2x16x422xbf16, #tpu.memory_space<vmem>>, vector<1x16x384xbf16>
    %28 = vector.shape_cast %27 : vector<1x16x384xbf16> to vector<16x384xbf16>
    %c0_31 = arith.constant 0 : index
    %c384 = arith.constant 384 : index
    %29 = vector.load %arg10[%c0_31, %c384] : memref<144x768xbf16, #tpu.memory_space<vmem>>, vector<16x384xbf16>
    tpu.vector_store %arg10[%c0_31, %c384], %28 {strides = array<i32>} : memref<144x768xbf16, #tpu.memory_space<vmem>>, vector<16x384xbf16>,
    %c1_32 = arith.constant 1 : index
    %c0_33 = arith.constant 0 : index
    %c1_34 = arith.constant 1 : index
    %30 = vector.load %arg1[%c1_32, %c0_33, %c1_34] : memref<2x16x422xbf16, #tpu.memory_space<vmem>>, vector<1x16x384xbf16>
    %31 = vector.shape_cast %30 : vector<1x16x384xbf16> to vector<16x384xbf16>
    %c16_35 = arith.constant 16 : index
    %c384_36 = arith.constant 384 : index
    %32 = vector.load %arg10[%c16_35, %c384_36] : memref<144x768xbf16, #tpu.memory_space<vmem>>, vector<16x384xbf16>
    tpu.vector_store %arg10[%c16_35, %c384_36], %31 {strides = array<i32>} : memref<144x768xbf16, #tpu.memory_space<vmem>>, vector<16x384xbf16>,
    %c1_37 = arith.constant 1 : index
    %c0_38 = arith.constant 0 : index
    %c2_39 = arith.constant 2 : index
    %33 = vector.load %arg1[%c1_37, %c0_38, %c2_39] : memref<2x16x422xbf16, #tpu.memory_space<vmem>>, vector<1x16x384xbf16>
    %34 = vector.shape_cast %33 : vector<1x16x384xbf16> to vector<16x384xbf16>
    %c32_40 = arith.constant 32 : index
    %c384_41 = arith.constant 384 : index
    %35 = vector.load %arg10[%c32_40, %c384_41] : memref<144x768xbf16, #tpu.memory_space<vmem>>, vector<16x384xbf16>
    tpu.vector_store %arg10[%c32_40, %c384_41], %34 {strides = array<i32>} : memref<144x768xbf16, #tpu.memory_space<vmem>>, vector<16x384xbf16>,
    %c1_42 = arith.constant 1 : index
    %c0_43 = arith.constant 0 : index
    %c18_44 = arith.constant 18 : index
    %36 = vector.load %arg1[%c1_42, %c0_43, %c18_44] : memref<2x16x422xbf16, #tpu.memory_space<vmem>>, vector<1x16x384xbf16>
    %37 = vector.shape_cast %36 : vector<1x16x384xbf16> to vector<16x384xbf16>
    %c48_45 = arith.constant 48 : index
    %c384_46 = arith.constant 384 : index
    %38 = vector.load %arg10[%c48_45, %c384_46] : memref<144x768xbf16, #tpu.memory_space<vmem>>, vector<16x384xbf16>
    tpu.vector_store %arg10[%c48_45, %c384_46], %37 {strides = array<i32>} : memref<144x768xbf16, #tpu.memory_space<vmem>>, vector<16x384xbf16>,
    %c1_47 = arith.constant 1 : index
    %c0_48 = arith.constant 0 : index
    %c19_49 = arith.constant 19 : index
    %39 = vector.load %arg1[%c1_47, %c0_48, %c19_49] : memref<2x16x422xbf16, #tpu.memory_space<vmem>>, vector<1x16x384xbf16>
    %40 = vector.shape_cast %39 : vector<1x16x384xbf16> to vector<16x384xbf16>
    %c64_50 = arith.constant 64 : index
    %c384_51 = arith.constant 384 : index
    %41 = vector.load %arg10[%c64_50, %c384_51] : memref<144x768xbf16, #tpu.memory_space<vmem>>, vector<16x384xbf16>
    tpu.vector_store %arg10[%c64_50, %c384_51], %40 {strides = array<i32>} : memref<144x768xbf16, #tpu.memory_space<vmem>>, vector<16x384xbf16>,
    %c1_52 = arith.constant 1 : index
    %c0_53 = arith.constant 0 : index
    %c20_54 = arith.constant 20 : index
    %42 = vector.load %arg1[%c1_52, %c0_53, %c20_54] : memref<2x16x422xbf16, #tpu.memory_space<vmem>>, vector<1x16x384xbf16>
    %43 = vector.shape_cast %42 : vector<1x16x384xbf16> to vector<16x384xbf16>
    %c80_55 = arith.constant 80 : index
    %c384_56 = arith.constant 384 : index
    %44 = vector.load %arg10[%c80_55, %c384_56] : memref<144x768xbf16, #tpu.memory_space<vmem>>, vector<16x384xbf16>
    tpu.vector_store %arg10[%c80_55, %c384_56], %43 {strides = array<i32>} : memref<144x768xbf16, #tpu.memory_space<vmem>>, vector<16x384xbf16>,
    %c1_57 = arith.constant 1 : index
    %c0_58 = arith.constant 0 : index
    %c36_59 = arith.constant 36 : index
    %45 = vector.load %arg1[%c1_57, %c0_58, %c36_59] : memref<2x16x422xbf16, #tpu.memory_space<vmem>>, vector<1x16x384xbf16>
    %46 = vector.shape_cast %45 : vector<1x16x384xbf16> to vector<16x384xbf16>
    %c96_60 = arith.constant 96 : index
    %c384_61 = arith.constant 384 : index
    %47 = vector.load %arg10[%c96_60, %c384_61] : memref<144x768xbf16, #tpu.memory_space<vmem>>, vector<16x384xbf16>
    tpu.vector_store %arg10[%c96_60, %c384_61], %46 {strides = array<i32>} : memref<144x768xbf16, #tpu.memory_space<vmem>>, vector<16x384xbf16>,
    %c1_62 = arith.constant 1 : index
    %c0_63 = arith.constant 0 : index
    %c37_64 = arith.constant 37 : index
    %48 = vector.load %arg1[%c1_62, %c0_63, %c37_64] : memref<2x16x422xbf16, #tpu.memory_space<vmem>>, vector<1x16x384xbf16>
    %49 = vector.shape_cast %48 : vector<1x16x384xbf16> to vector<16x384xbf16>
    %c112_65 = arith.constant 112 : index
    %c384_66 = arith.constant 384 : index
    %50 = vector.load %arg10[%c112_65, %c384_66] : memref<144x768xbf16, #tpu.memory_space<vmem>>, vector<16x384xbf16>
    tpu.vector_store %arg10[%c112_65, %c384_66], %49 {strides = array<i32>} : memref<144x768xbf16, #tpu.memory_space<vmem>>, vector<16x384xbf16>,
    %c1_67 = arith.constant 1 : index
    %c0_68 = arith.constant 0 : index
    %c38_69 = arith.constant 38 : index
    %51 = vector.load %arg1[%c1_67, %c0_68, %c38_69] : memref<2x16x422xbf16, #tpu.memory_space<vmem>>, vector<1x16x384xbf16>
    %52 = vector.shape_cast %51 : vector<1x16x384xbf16> to vector<16x384xbf16>
    %c128_70 = arith.constant 128 : index
    %c384_71 = arith.constant 384 : index
    %53 = vector.load %arg10[%c128_70, %c384_71] : memref<144x768xbf16, #tpu.memory_space<vmem>>, vector<16x384xbf16>
    tpu.vector_store %arg10[%c128_70, %c384_71], %52 {strides = array<i32>} : memref<144x768xbf16, #tpu.memory_space<vmem>>, vector<16x384xbf16>,
    %c0_72 = arith.constant 0 : index
    %c0_73 = arith.constant 0 : index
    %54 = vector.load %arg2[%c0_72, %c0_73] : memref<8x144xbf16, #tpu.memory_space<vmem>>, vector<8x144xbf16>
    %c0_74 = arith.constant 0 : index
    %c0_75 = arith.constant 0 : index
    %55 = vector.load %arg10[%c0_74, %c0_75] : memref<144x768xbf16, #tpu.memory_space<vmem>>, vector<144x768xbf16>
    %cst = arith.constant dense<0.000000e+00> : vector<8x768xf32>
    %56 = tpu.matmul %54, %55, %cst {dimension_numbers = #tpu.dot_dimension_numbers<[1], [0], [0], [1], [0, 0, 1, 1], [], []>} : vector<8x144xbf16>, vector<144x768xbf16>, vector<8x768xf32> -> vector<8x768xf32>
    %c0_76 = arith.constant 0 : index
    %c0_77 = arith.constant 0 : index
    %57 = vector.load %arg3[%c0_76, %c0_77] : memref<8x1xf32, #tpu.memory_space<vmem>>, vector<8x1xf32>
    %58 = vector.broadcast %57 : vector<8x1xf32> to vector<8x768xf32>
    %59 = arith.addf %56, %58 : vector<8x768xf32>
    %c0_78 = arith.constant 0 : index
    %c0_79 = arith.constant 0 : index
    %60 = vector.load %arg6[%c0_78, %c0_79] : memref<1x768xf32, #tpu.memory_space<vmem>>, vector<1x768xf32>
    %61 = vector.broadcast %60 : vector<1x768xf32> to vector<8x768xf32>
    %62 = arith.mulf %59, %61 : vector<8x768xf32>
    %63 = vector.extract_strided_slice %62 {offsets = [0, 0], sizes = [8, 384], strides = [1, 1]} : vector<8x768xf32> to vector<8x384xf32>
    %cst_80 = arith.constant dense<0.000000e+00> : vector<8xf32>
    %64 = vector.multi_reduction <add>, %63, %cst_80 [1] : vector<8x384xf32> to vector<8xf32>
    %65 = vector.shape_cast %64 : vector<8xf32> to vector<8x1xf32>
    %c0_81 = arith.constant 0 : index
    %c0_82 = arith.constant 0 : index
    %66 = vector.load %arg11[%c0_81, %c0_82] : memref<8x4xf32, #tpu.memory_space<vmem>>, vector<8x1xf32>
    tpu.vector_store %arg11[%c0_81, %c0_82], %65 {strides = array<i32>} : memref<8x4xf32, #tpu.memory_space<vmem>>, vector<8x1xf32>,
    %67 = arith.mulf %63, %63 : vector<8x384xf32>
    %cst_83 = arith.constant dense<0.000000e+00> : vector<8xf32>
    %68 = vector.multi_reduction <add>, %67, %cst_83 [1] : vector<8x384xf32> to vector<8xf32>
    %69 = vector.shape_cast %68 : vector<8xf32> to vector<8x1xf32>
    %c0_84 = arith.constant 0 : index
    %c2_85 = arith.constant 2 : index
    %70 = vector.load %arg11[%c0_84, %c2_85] : memref<8x4xf32, #tpu.memory_space<vmem>>, vector<8x1xf32>
    tpu.vector_store %arg11[%c0_84, %c2_85], %69 {strides = array<i32>} : memref<8x4xf32, #tpu.memory_space<vmem>>, vector<8x1xf32>,
    %71 = vector.extract_strided_slice %62 {offsets = [0, 384], sizes = [8, 384], strides = [1, 1]} : vector<8x768xf32> to vector<8x384xf32>
    %cst_86 = arith.constant dense<0.000000e+00> : vector<8xf32>
    %72 = vector.multi_reduction <add>, %71, %cst_86 [1] : vector<8x384xf32> to vector<8xf32>
    %73 = vector.shape_cast %72 : vector<8xf32> to vector<8x1xf32>
    %c0_87 = arith.constant 0 : index
    %c1_88 = arith.constant 1 : index
    %74 = vector.load %arg11[%c0_87, %c1_88] : memref<8x4xf32, #tpu.memory_space<vmem>>, vector<8x1xf32>
    tpu.vector_store %arg11[%c0_87, %c1_88], %73 {strides = array<i32>} : memref<8x4xf32, #tpu.memory_space<vmem>>, vector<8x1xf32>,
    %75 = arith.mulf %71, %71 : vector<8x384xf32>
    %cst_89 = arith.constant dense<0.000000e+00> : vector<8xf32>
    %76 = vector.multi_reduction <add>, %75, %cst_89 [1] : vector<8x384xf32> to vector<8xf32>
    %77 = vector.shape_cast %76 : vector<8xf32> to vector<8x1xf32>
    %c0_90 = arith.constant 0 : index
    %c3 = arith.constant 3 : index
    %78 = vector.load %arg11[%c0_90, %c3] : memref<8x4xf32, #tpu.memory_space<vmem>>, vector<8x1xf32>
    tpu.vector_store %arg11[%c0_90, %c3], %77 {strides = array<i32>} : memref<8x4xf32, #tpu.memory_space<vmem>>, vector<8x1xf32>,
    %c0_91 = arith.constant 0 : index
    %c0_92 = arith.constant 0 : index
    %79 = vector.load %arg7[%c0_91, %c0_92] : memref<2x8xf32, #tpu.memory_space<vmem>>, vector<2x8xf32>
    %c0_93 = arith.constant 0 : index
    %c0_94 = arith.constant 0 : index
    %80 = vector.load %arg11[%c0_93, %c0_94] : memref<8x4xf32, #tpu.memory_space<vmem>>, vector<8x4xf32>
    %cst_95 = arith.constant dense<0.000000e+00> : vector<2x4xf32>
    %81 = tpu.matmul %79, %80, %cst_95 {dimension_numbers = #tpu.dot_dimension_numbers<[1], [0], [0], [1], [0, 0, 1, 1], [], []>} : vector<2x8xf32>, vector<8x4xf32>, vector<2x4xf32> -> vector<2x4xf32>
    %cst_96 = arith.constant 9.765625E-4 : f32
    %82 = vector.broadcast %cst_96 : f32 to vector<2x4xf32>
    %83 = arith.mulf %81, %82 : vector<2x4xf32>
    %84 = vector.extract_strided_slice %83 {offsets = [0, 0], sizes = [2, 2], strides = [1, 1]} : vector<2x4xf32> to vector<2x2xf32>
    %85 = vector.extract_strided_slice %83 {offsets = [0, 2], sizes = [2, 2], strides = [1, 1]} : vector<2x4xf32> to vector<2x2xf32>
    %86 = arith.mulf %84, %84 : vector<2x2xf32>
    %87 = arith.subf %85, %86 : vector<2x2xf32>
    %cst_97 = arith.constant 9.99999974E-6 : f32
    %88 = vector.broadcast %cst_97 : f32 to vector<2x2xf32>
    %89 = arith.addf %87, %88 : vector<2x2xf32>
    %90 = math.rsqrt %89 : vector<2x2xf32>
    %c0_98 = arith.constant 0 : index
    %c0_99 = arith.constant 0 : index
    %91 = vector.load %arg12[%c0_98, %c0_99] : memref<2x4xf32, #tpu.memory_space<vmem>>, vector<2x2xf32>
    tpu.vector_store %arg12[%c0_98, %c0_99], %84 {strides = array<i32>} : memref<2x4xf32, #tpu.memory_space<vmem>>, vector<2x2xf32>,
    %c0_100 = arith.constant 0 : index
    %c2_101 = arith.constant 2 : index
    %92 = vector.load %arg12[%c0_100, %c2_101] : memref<2x4xf32, #tpu.memory_space<vmem>>, vector<2x2xf32>
    tpu.vector_store %arg12[%c0_100, %c2_101], %90 {strides = array<i32>} : memref<2x4xf32, #tpu.memory_space<vmem>>, vector<2x2xf32>,
    %c0_102 = arith.constant 0 : index
    %c0_103 = arith.constant 0 : index
    %93 = vector.load %arg8[%c0_102, %c0_103] : memref<8x2xf32, #tpu.memory_space<vmem>>, vector<8x2xf32>
    %c0_104 = arith.constant 0 : index
    %c0_105 = arith.constant 0 : index
    %94 = vector.load %arg12[%c0_104, %c0_105] : memref<2x4xf32, #tpu.memory_space<vmem>>, vector<2x4xf32>
    %cst_106 = arith.constant dense<0.000000e+00> : vector<8x4xf32>
    %95 = tpu.matmul %93, %94, %cst_106 {dimension_numbers = #tpu.dot_dimension_numbers<[1], [0], [0], [1], [0, 0, 1, 1], [], []>} : vector<8x2xf32>, vector<2x4xf32>, vector<8x4xf32> -> vector<8x4xf32>
    %c0_107 = arith.constant 0 : index
    %c0_108 = arith.constant 0 : index
    %96 = vector.load %arg4[%c0_107, %c0_108] : memref<8x1xf32, #tpu.memory_space<vmem>>, vector<8x1xf32>
    %c0_109 = arith.constant 0 : index
    %c0_110 = arith.constant 0 : index
    %97 = vector.load %arg5[%c0_109, %c0_110] : memref<8x1xf32, #tpu.memory_space<vmem>>, vector<8x1xf32>
    %98 = vector.extract_strided_slice %95 {offsets = [0, 0], sizes = [8, 1], strides = [1, 1]} : vector<8x4xf32> to vector<8x1xf32>
    %99 = vector.extract_strided_slice %95 {offsets = [0, 2], sizes = [8, 1], strides = [1, 1]} : vector<8x4xf32> to vector<8x1xf32>
    %100 = vector.extract_strided_slice %59 {offsets = [0, 0], sizes = [8, 384], strides = [1, 1]} : vector<8x768xf32> to vector<8x384xf32>
    %101 = vector.broadcast %98 : vector<8x1xf32> to vector<8x384xf32>
    %102 = arith.subf %100, %101 : vector<8x384xf32>
    %103 = arith.mulf %99, %96 : vector<8x1xf32>
    %104 = vector.broadcast %103 : vector<8x1xf32> to vector<8x384xf32>
    %105 = arith.mulf %102, %104 : vector<8x384xf32>
    %106 = vector.broadcast %97 : vector<8x1xf32> to vector<8x384xf32>
    %107 = arith.addf %105, %106 : vector<8x384xf32>
    %cst_111 = arith.constant 0.000000e+00 : f32
    %108 = vector.broadcast %cst_111 : f32 to vector<8x384xf32>
    %109 = arith.cmpf ogt, %107, %108 : vector<8x384xf32>
    %cst_112 = arith.constant 2.000000e-01 : f32
    %110 = vector.broadcast %cst_112 : f32 to vector<8x384xf32>
    %111 = arith.mulf %110, %107 : vector<8x384xf32>
    %112 = arith.select %109, %107, %111 : vector<8x384xi1>, vector<8x384xf32>
    %c0_113 = arith.constant 0 : index
    %c0_114 = arith.constant 0 : index
    %c0_115 = arith.constant 0 : index
    %113 = vector.load %arg9[%c0_113, %c0_114, %c0_115] : memref<2x8x384xf32, #tpu.memory_space<vmem>>, vector<1x8x384xf32>
    %114 = vector.shape_cast %113 : vector<1x8x384xf32> to vector<8x384xf32>
    %115 = vector.shape_cast %112 : vector<8x384xf32> to vector<1x8x384xf32>
    tpu.vector_store %arg9[%c0_113, %c0_114, %c0_115], %115 {strides = array<i32>} : memref<2x8x384xf32, #tpu.memory_space<vmem>>, vector<1x8x384xf32>,
    %116 = vector.extract_strided_slice %95 {offsets = [0, 1], sizes = [8, 1], strides = [1, 1]} : vector<8x4xf32> to vector<8x1xf32>
    %117 = vector.extract_strided_slice %95 {offsets = [0, 3], sizes = [8, 1], strides = [1, 1]} : vector<8x4xf32> to vector<8x1xf32>
    %118 = vector.extract_strided_slice %59 {offsets = [0, 384], sizes = [8, 384], strides = [1, 1]} : vector<8x768xf32> to vector<8x384xf32>
    %119 = vector.broadcast %116 : vector<8x1xf32> to vector<8x384xf32>
    %120 = arith.subf %118, %119 : vector<8x384xf32>
    %121 = arith.mulf %117, %96 : vector<8x1xf32>
    %122 = vector.broadcast %121 : vector<8x1xf32> to vector<8x384xf32>
    %123 = arith.mulf %120, %122 : vector<8x384xf32>
    %124 = vector.broadcast %97 : vector<8x1xf32> to vector<8x384xf32>
    %125 = arith.addf %123, %124 : vector<8x384xf32>
    %cst_116 = arith.constant 0.000000e+00 : f32
    %126 = vector.broadcast %cst_116 : f32 to vector<8x384xf32>
    %127 = arith.cmpf ogt, %125, %126 : vector<8x384xf32>
    %cst_117 = arith.constant 2.000000e-01 : f32
    %128 = vector.broadcast %cst_117 : f32 to vector<8x384xf32>
    %129 = arith.mulf %128, %125 : vector<8x384xf32>
    %130 = arith.select %127, %125, %129 : vector<8x384xi1>, vector<8x384xf32>
    %c1_118 = arith.constant 1 : index
    %c0_119 = arith.constant 0 : index
    %c0_120 = arith.constant 0 : index
    %131 = vector.load %arg9[%c1_118, %c0_119, %c0_120] : memref<2x8x384xf32, #tpu.memory_space<vmem>>, vector<1x8x384xf32>
    %132 = vector.shape_cast %131 : vector<1x8x384xf32> to vector<8x384xf32>
    %133 = vector.shape_cast %130 : vector<8x384xf32> to vector<1x8x384xf32>
    tpu.vector_store %arg9[%c1_118, %c0_119, %c0_120], %133 {strides = array<i32>} : memref<2x8x384xf32, #tpu.memory_space<vmem>>, vector<1x8x384xf32>,
    return
  }
  func.func @transform_0(%arg0: i32) -> (i32, i32, i32) {
    %c0_i32 = arith.constant 0 : i32
    %c0_i32_0 = arith.constant 0 : i32
    %c0_i32_1 = arith.constant 0 : i32
    return %arg0, %c0_i32, %c0_i32_0 : i32, i32, i32
  }
  func.func @transform_1(%arg0: i32) -> (i32, i32) {
    %c0_i32 = arith.constant 0 : i32
    %c0_i32_0 = arith.constant 0 : i32
    %c0_i32_1 = arith.constant 0 : i32
    return %c0_i32, %c0_i32_0 : i32, i32
  }
  func.func @transform_2(%arg0: i32) -> (i32, i32) {
    %c0_i32 = arith.constant 0 : i32
    %c0_i32_0 = arith.constant 0 : i32
    %c0_i32_1 = arith.constant 0 : i32
    return %c0_i32, %c0_i32_0 : i32, i32
  }
  func.func @transform_3(%arg0: i32) -> (i32, i32) {
    %c0_i32 = arith.constant 0 : i32
    %c0_i32_0 = arith.constant 0 : i32
    %c0_i32_1 = arith.constant 0 : i32
    return %c0_i32, %c0_i32_0 : i32, i32
  }
  func.func @transform_4(%arg0: i32) -> (i32, i32) {
    %c0_i32 = arith.constant 0 : i32
    %c0_i32_0 = arith.constant 0 : i32
    %c0_i32_1 = arith.constant 0 : i32
    return %c0_i32, %c0_i32_0 : i32, i32
  }
  func.func @transform_5(%arg0: i32) -> (i32, i32) {
    %c0_i32 = arith.constant 0 : i32
    %c0_i32_0 = arith.constant 0 : i32
    %c0_i32_1 = arith.constant 0 : i32
    return %c0_i32, %c0_i32_0 : i32, i32
  }
  func.func @transform_6(%arg0: i32) -> (i32, i32) {
    %c0_i32 = arith.constant 0 : i32
    %c0_i32_0 = arith.constant 0 : i32
    %c0_i32_1 = arith.constant 0 : i32
    return %c0_i32, %c0_i32_0 : i32, i32
  }
  func.func @transform_7(%arg0: i32) -> (i32, i32) {
    %c0_i32 = arith.constant 0 : i32
    %c0_i32_0 = arith.constant 0 : i32
    %c0_i32_1 = arith.constant 0 : i32
    return %c0_i32, %c0_i32_0 : i32, i32
  }
  func.func @transform_8(%arg0: i32) -> (i32, i32, i32) {
    %c0_i32 = arith.constant 0 : i32
    %c0_i32_0 = arith.constant 0 : i32
    %c0_i32_1 = arith.constant 0 : i32
    return %arg0, %c0_i32, %c0_i32_0 : i32, i32, i32
  }
}

</mosaic_0001>

<bundles_post_ra>
// kernel: tpu_custom_call.1
= control target key start
LH: loop header
LB: loop body
LE: loop exit
PB: predicated region body
PF: predicated region fallthrough
CT: control target
= control target key end

     0   :  { %13 = vsyncpa [#allocation6], 0  ;;  %s1984_s0 = inlined_call_operand.hbm [shape: bf16[2,16,422], index: 0, kind: input, shape index: {}]   ;;  %s1985_s1 = inlined_call_operand.vmem [shape: bf16[8,144], index: 1, kind: input, shape index: {}]   ;;  %s1986_s2 = inlined_call_operand.vmem [shape: f32[8,1], index: 2, kind: input, shape index: {}]   ;;  %s1987_s3 = inlined_call_operand.vmem [shape: f32[8,1], index: 3, kind: input, shape index: {}]   ;;  %s1988_s4 = inlined_call_operand.vmem [shape: f32[8,1], index: 4, kind: input, shape index: {}]   ;;  %s1989_s5 = inlined_call_operand.vmem [shape: f32[1,768], index: 5, kind: input, shape index: {}]   ;;  %s1990_s6 = inlined_call_operand.vmem [shape: f32[2,8], index: 6, kind: input, shape index: {}]   ;;  %s1991_s7 = inlined_call_operand.vmem [shape: f32[8,2], index: 7, kind: input, shape index: {}]   ;;  %s1992_s8 = inlined_call_operand.hbm [shape: f32[2,8,384], index: 8, kind: output, shape index: {}]  }
   0x1   :  { %14 = vsyncpa [#allocation7], 0  ;;  %s1620_s27 = smov [#allocation5]  }
   0x2   :  { %s20_s28 = sshll.u32 %s1620_s27, 4  ;;  %s21_s28 = int_to_ptr.vmem [resolvable:$true] %s20_s28 }
   0x3   :  { %s1584_s29 = scalar_lea.vmem %s21_s28, 1024  ;;  %p1589_p1 = scmp.lt.s32.totalorder %s21_s28, %s21_s28 }
   0x4   :  { %p1585_p0 = scmp.ne.s32.totalorder %s21_s28, %s1584_s29  ;;  %p1590_p2 = scmp.lt.s32.totalorder %s1584_s29, %s1584_s29 }
   0x6   :  { %p1591_p3 = por %p1590_p2, %p1589_p1 }
   0x8   :  { %p1592_p4 = pnand %p1591_p3, %p1585_p0 }
   0xa   :  { %1595 = shalt.err (!%p1592_p4)
}
   0xb   :  { %s1621_s30 = smov 256   ;;  %s1622_s9 = smov 16  }
   0xc   :  { %26 = dma.hbm_to_vmem [thread:$0]  %s1984_s0, 1024, %s21_s28, [#allocation6], %s1621_s30, %s1621_s30, %s1622_s9  }
   0xd   :  { %1616 = dma.done.wait [#allocation6], 1024  }
   0xe   :  { %1617 = vsyncadd [#allocation6], 4294966272  ;;  %v1690_v0 = vld [vmem:[#allocation5 + $0x10] sm:$0xff]  ;;  %v1692_v1 = vld [vmem:[#allocation5] sm:$0xff]  ;;  %s1623_s12 = smov 91   ;;  %s1624_s0 = smov 92  }
   0xf   :  { %276 = vrot.lane.b32.xlu1 %v1690_v0, %s1623_s12  ;;  %272 = vrot.lane.b32.xlu0 %v1692_v1, %s1623_s12  ;;  %v1698_v2 = vld [vmem:[#allocation5 + $0x20] sm:$0xff]  ;;  %v267_v3 = vld [vmem:[#allocation5 + $0x18] sm:$0xff]  ;;  %v265_v4 = vld [vmem:[#allocation5 + $0x8] sm:$0xff]  ;;  %s1625_s13 = smov 108   ;;  %s1626_s14 = smov 109   ;;  %v1414_v6 = vcombine.high %v1692_v1, %v1690_v0  ;;  %v1413_v7 = vcombine.low %v1692_v1, %v1690_v0  ;;  %vm952_vm0 = vcmask 130048  }
  0x10   :  { %v1700_v5 = vld [vmem:[#allocation5 + $0x30] sm:$0xff]  ;;  %339 = vst [vmem:[#allocation2 + $0xc] sm:$0xff] %v1698_v2  ;;  %s1627_s15 = smov 110   ;;  %s1628_s16 = smov 126   ;;  %v548_v8 = vld [vmem:[#allocation5 + $0x28] sm:$0xff]  ;;  %v1755_v9 = vld [vmem:[#allocation5 + $0x38] sm:$0xff] }
  0x11   :  { %341 = vst [vmem:[#allocation2 + $0x24] sm:$0xff] %v1700_v5  ;;  %s1629_s17 = smov 127   ;;  %s1630_s18 = smov 90   ;;  %v1760_v10 = vld [vmem:[%s1985_s1] sm:$0xff]  ;;  %v48_v13 = vld [vmem:[#allocation5 + $0x18] sm:$0xf] }
  0x12   :  { %v1764_v11 = vcombine.high %v1760_v10, %v1760_v10  ;;  %v46_v12 = vld [vmem:[#allocation5 + $0x8] sm:$0xf]  ;;  %52 = vst [vmem:[#allocation2 + $0x20] sm:$0xf] %v48_v13  ;;  %v338_v15 = vld [vmem:[#allocation5 + $0x38] sm:$0xf] }
  0x13   :  { %278 = vrot.lane.b32.xlu1 %v267_v3, %s1623_s12  ;;  %274 = vrot.lane.b32.xlu0 %v265_v4, %s1623_s12  ;;  %v336_v14 = vld [vmem:[#allocation5 + $0x28] sm:$0xf]  ;;  %50 = vst [vmem:[#allocation2 + $0x8] sm:$0xf] %v46_v12  ;;  %342 = vst [vmem:[#allocation2 + $0x2c] sm:$0xf] %v338_v15 }
  0x14   :  { %1467 = vmatprep.mubr.msk.bf16.mxu0 %vm952_vm0, %v1764_v11  ;;  %1468 = vmatprep.mubr.msk.bf16.mxu1 %vm952_vm0, %v1764_v11  ;;  %340 = vst [vmem:[#allocation2 + $0x14] sm:$0xf] %v336_v14  ;;  %vm73_vm1 = vcmask 1043456   ;;  %vm285_vm2 = vcmask 744448   ;;  %vm250_vm3 = vcmask 752640   ;;  %v670_v45 = vld [vmem:[%s1986_s2] sm:$0xff] }
  0x15   :  { %vm215_vm4 = vcmask 883712   ;;  %v1631_v49 = vmov 0   ;;  %vm180_vm5 = vcmask 891904   ;;  %vm145_vm6 = vcmask 900096   ;;  %s1634_s24 = smov 2  }
  0x16   :  { %1509 = vset.pattern.permute.xlu0 %v1631_v49  ;;  %1510 = vset.pattern.permute.xlu1 %v1631_v49  ;;  %vm110_vm7 = vcmask 1031168   ;;  %vm75_vm8 = vcmask 1039360   ;;  %vm320_vm9 = vcmask 736256   ;;  %vm1633_vm10 = vmmov 0  }
  0x17   :  { %239 = vrot.lane.b32.xlu1 %v265_v4, %s1624_s0  ;;  %237 = vrot.lane.b32.xlu0 %v1692_v1, %s1624_s0  ;;  %vm1121_vm11 = vcmask 7168   ;;  %vm1130_vm12 = vcmask 23568   ;;  %vm1136_vm13 = vcmask 15368   ;;  %vm1145_vm14 = vcmask 31768  }
  0x18   :  { %vm1149_vm15 = vcmask 64512  }
  0x1b   :  { %243 = vrot.lane.b32.xlu1 %v267_v3, %s1624_s0  ;;  %241 = vrot.lane.b32.xlu0 %v1690_v0, %s1624_s0 }
  0x1f   :  { %204 = vrot.lane.b32.xlu1 %v265_v4, %s1625_s13  ;;  %202 = vrot.lane.b32.xlu0 %v1692_v1, %s1625_s13 }
  0x23   :  { %208 = vrot.lane.b32.xlu1 %v267_v3, %s1625_s13  ;;  %206 = vrot.lane.b32.xlu0 %v1690_v0, %s1625_s13 }
  0x27   :  { %169 = vrot.lane.b32.xlu1 %v265_v4, %s1626_s14  ;;  %167 = vrot.lane.b32.xlu0 %v1692_v1, %s1626_s14 }
  0x2b   :  { %173 = vrot.lane.b32.xlu1 %v267_v3, %s1626_s14  ;;  %171 = vrot.lane.b32.xlu0 %v1690_v0, %s1626_s14 }
  0x2f   :  { %134 = vrot.lane.b32.xlu1 %v265_v4, %s1627_s15  ;;  %132 = vrot.lane.b32.xlu0 %v1692_v1, %s1627_s15 }
  0x33   :  { %138 = vrot.lane.b32.xlu1 %v267_v3, %s1627_s15  ;;  %136 = vrot.lane.b32.xlu0 %v1690_v0, %s1627_s15 }
  0x37   :  { %99 = vrot.lane.b32.xlu1 %v265_v4, %s1628_s16  ;;  %97 = vrot.lane.b32.xlu0 %v1692_v1, %s1628_s16 }
  0x3b   :  { %103 = vrot.lane.b32.xlu1 %v267_v3, %s1628_s16  ;;  %101 = vrot.lane.b32.xlu0 %v1690_v0, %s1628_s16 }
  0x3f   :  { %63 = vrot.lane.b32.xlu1 %v265_v4, %s1629_s17  ;;  %61 = vrot.lane.b32.xlu0 %v1692_v1, %s1629_s17 }
  0x43   :  { %67 = vrot.lane.b32.xlu1 %v267_v3, %s1629_s17  ;;  %65 = vrot.lane.b32.xlu0 %v1690_v0, %s1629_s17 }
  0x47   :  { %309 = vrot.lane.b32.xlu1 %v265_v4, %s1630_s18  ;;  %307 = vrot.lane.b32.xlu0 %v1692_v1, %s1630_s18 }
  0x4b   :  { %313 = vrot.lane.b32.xlu1 %v267_v3, %s1630_s18  ;;  %311 = vrot.lane.b32.xlu0 %v1690_v0, %s1630_s18 }
  0x4f   :  { %557 = vrot.lane.b32.xlu1 %v548_v8, %s1623_s12  ;;  %555 = vrot.lane.b32.xlu0 %v1698_v2, %s1623_s12 }
  0x53   :  { %561 = vrot.lane.b32.xlu1 %v1755_v9, %s1623_s12  ;;  %559 = vrot.lane.b32.xlu0 %v1700_v5, %s1623_s12 }
  0x57   :  { %523 = vrot.lane.b32.xlu1 %v548_v8, %s1624_s0  ;;  %521 = vrot.lane.b32.xlu0 %v1698_v2, %s1624_s0 }
  0x5b   :  { %527 = vrot.lane.b32.xlu1 %v1755_v9, %s1624_s0  ;;  %525 = vrot.lane.b32.xlu0 %v1700_v5, %s1624_s0 }
  0x5f   :  { %489 = vrot.lane.b32.xlu1 %v548_v8, %s1625_s13  ;;  %487 = vrot.lane.b32.xlu0 %v1698_v2, %s1625_s13 }
  0x63   :  { %493 = vrot.lane.b32.xlu1 %v1755_v9, %s1625_s13  ;;  %491 = vrot.lane.b32.xlu0 %v1700_v5, %s1625_s13 }
  0x67   :  { %455 = vrot.lane.b32.xlu1 %v548_v8, %s1626_s14  ;;  %453 = vrot.lane.b32.xlu0 %v1698_v2, %s1626_s14 }
  0x6b   :  { %459 = vrot.lane.b32.xlu1 %v1755_v9, %s1626_s14  ;;  %457 = vrot.lane.b32.xlu0 %v1700_v5, %s1626_s14 }
  0x6f   :  { %421 = vrot.lane.b32.xlu1 %v548_v8, %s1627_s15  ;;  %419 = vrot.lane.b32.xlu0 %v1698_v2, %s1627_s15 }
  0x73   :  { %425 = vrot.lane.b32.xlu1 %v1755_v9, %s1627_s15  ;;  %423 = vrot.lane.b32.xlu0 %v1700_v5, %s1627_s15 }
  0x77   :  { %387 = vrot.lane.b32.xlu1 %v548_v8, %s1628_s16  ;;  %385 = vrot.lane.b32.xlu0 %v1698_v2, %s1628_s16 }
  0x7b   :  { %391 = vrot.lane.b32.xlu1 %v1755_v9, %s1628_s16  ;;  %389 = vrot.lane.b32.xlu0 %v1700_v5, %s1628_s16 }
  0x7f   :  { %353 = vrot.lane.b32.xlu1 %v548_v8, %s1629_s17  ;;  %351 = vrot.lane.b32.xlu0 %v1698_v2, %s1629_s17 }
  0x81   :  { %v277_v16 = vpop.permute.xlu1 %276  ;;  %v273_v17 = vpop.permute.xlu0 %272 }
  0x82   :  { %v282_v20 = vrot.slane %v277_v16, 4  ;;  %v280_v21 = vrot.slane %v273_v17, 4 }
  0x83   :  { %357 = vrot.lane.b32.xlu1 %v1755_v9, %s1629_s17  ;;  %355 = vrot.lane.b32.xlu0 %v1700_v5, %s1629_s17 }
  0x85   :  { %v279_v18 = vpop.permute.xlu1 %278  ;;  %v275_v19 = vpop.permute.xlu0 %274 }
  0x86   :  { %v283_v22 = vrot.slane %v279_v18, 4  ;;  %v281_v23 = vrot.slane %v275_v19, 4 }
  0x87   :  { %591 = vrot.lane.b32.xlu1 %v548_v8, %s1630_s18  ;;  %589 = vrot.lane.b32.xlu0 %v1698_v2, %s1630_s18 }
  0x88   :  { %v288_v24 = vsel %vm73_vm1, %v282_v20, %v283_v22  ;;  %v290_v25 = vsel %vm285_vm2, %v279_v18, %v283_v22  ;;  %v284_v26 = vsel %vm73_vm1, %v280_v21, %v281_v23  ;;  %v287_v27 = vsel %vm285_vm2, %v275_v19, %v281_v23 }
  0x89   :  { %v289_v28 = vsel %vm285_vm2, %v277_v16, %v288_v24  ;;  %298 = vst [vmem:[#allocation2 + $0x170] sm:$0xf] %v290_v25  ;;  %v286_v29 = vsel %vm285_vm2, %v273_v17, %v284_v26  ;;  %296 = vst [vmem:[#allocation2 + $0x158] sm:$0xf] %v287_v27  ;;  %v240_v30 = vpop.permute.xlu1 %239  ;;  %v238_v31 = vpop.permute.xlu0 %237 }
  0x8a   :  { %v246_v32 = vrot.slane %v240_v30, 4  ;;  %v245_v33 = vrot.slane %v238_v31, 4  ;;  %v1456_v34 = vcombine.high %v286_v29, %v289_v28  ;;  %v1455_v35 = vcombine.low %v286_v29, %v289_v28 }
  0x8b   :  { %595 = vrot.lane.b32.xlu1 %v1755_v9, %s1630_s18  ;;  %593 = vrot.lane.b32.xlu0 %v1700_v5, %s1630_s18 }
  0x8c   :  { %v252_v36 = vsel %vm250_vm3, %v240_v30, %v246_v32  ;;  %v249_v37 = vsel %vm73_vm1, %v245_v33, %v246_v32  ;;  %956 = vmatprep.subr.bf16.mxu0 %v1456_v34 }
  0x8d   :  { %261 = vst [vmem:[#allocation2 + $0x128] sm:$0xf] %v252_v36  ;;  %v251_v38 = vsel %vm250_vm3, %v238_v31, %v249_v37  ;;  %v244_v39 = vpop.permute.xlu1 %243  ;;  %v242_v40 = vpop.permute.xlu0 %241  ;;  %957 = vmatpush1.bf16.msra.mxu0 %v1455_v35 }
  0x8e   :  { %v248_v41 = vrot.slane %v244_v39, 4  ;;  %v247_v42 = vrot.slane %v242_v40, 4 }
  0x8f   :  { %673 = vperm.xlu0 %1509, %v670_v45  }
  0x90   :  { %v255_v43 = vsel %vm250_vm3, %v244_v39, %v248_v41  ;;  %v253_v44 = vsel %vm73_vm1, %v247_v42, %v248_v41 }
  0x91   :  { %263 = vst [vmem:[#allocation2 + $0x140] sm:$0xf] %v255_v43  ;;  %v254_v46 = vsel %vm250_vm3, %v242_v40, %v253_v44  ;;  %v205_v47 = vpop.permute.xlu1 %204  ;;  %v203_v48 = vpop.permute.xlu0 %202 }
  0x92   :  { %v211_v50 = vrot.slane %v205_v47, 4  ;;  %v210_v51 = vrot.slane %v203_v48, 4  ;;  %v1450_v52 = vcombine.high %v251_v38, %v254_v46  ;;  %v1449_v53 = vcombine.low %v251_v38, %v254_v46 }
  0x94   :  { %v217_v54 = vsel %vm215_vm4, %v205_v47, %v211_v50  ;;  %v214_v55 = vsel %vm73_vm1, %v210_v51, %v211_v50  ;;  %958 = vmatprep.subr.bf16.mxu0 %v1450_v52 }
  0x95   :  { %226 = vst [vmem:[#allocation2 + $0xf8] sm:$0xf] %v217_v54  ;;  %v216_v56 = vsel %vm215_vm4, %v203_v48, %v214_v55  ;;  %v209_v57 = vpop.permute.xlu1 %208  ;;  %v207_v58 = vpop.permute.xlu0 %206  ;;  %959 = vmatpush1.bf16.msra.mxu0 %v1449_v53 }
  0x96   :  { %v213_v59 = vrot.slane %v209_v57, 4  ;;  %v212_v60 = vrot.slane %v207_v58, 4 }
  0x98   :  { %v220_v61 = vsel %vm215_vm4, %v209_v57, %v213_v59  ;;  %v218_v62 = vsel %vm73_vm1, %v212_v60, %v213_v59 }
  0x99   :  { %228 = vst [vmem:[#allocation2 + $0x110] sm:$0xf] %v220_v61  ;;  %v219_v63 = vsel %vm215_vm4, %v207_v58, %v218_v62  ;;  %v170_v2 = vpop.permute.xlu1 %169  ;;  %v168_v3 = vpop.permute.xlu0 %167 }
  0x9a   :  { %v176_v4 = vrot.slane %v170_v2, 4  ;;  %v175_v5 = vrot.slane %v168_v3, 4  ;;  %v1444_v8 = vcombine.high %v216_v56, %v219_v63  ;;  %v1443_v9 = vcombine.low %v216_v56, %v219_v63 }
  0x9c   :  { %v182_v12 = vsel %vm180_vm5, %v170_v2, %v176_v4  ;;  %v179_v13 = vsel %vm73_vm1, %v175_v5, %v176_v4  ;;  %960 = vmatprep.subr.bf16.mxu0 %v1444_v8 }
  0x9d   :  { %191 = vst [vmem:[#allocation2 + $0xc8] sm:$0xf] %v182_v12  ;;  %v181_v14 = vsel %vm180_vm5, %v168_v3, %v179_v13  ;;  %v174_v15 = vpop.permute.xlu1 %173  ;;  %v172_v16 = vpop.permute.xlu0 %171  ;;  %961 = vmatpush1.bf16.msra.mxu0 %v1443_v9 }
  0x9e   :  { %v178_v17 = vrot.slane %v174_v15, 4  ;;  %v177_v18 = vrot.slane %v172_v16, 4 }
  0xa0   :  { %v185_v19 = vsel %vm180_vm5, %v174_v15, %v178_v17  ;;  %v183_v20 = vsel %vm73_vm1, %v177_v18, %v178_v17 }
  0xa1   :  { %193 = vst [vmem:[#allocation2 + $0xe0] sm:$0xf] %v185_v19  ;;  %v184_v21 = vsel %vm180_vm5, %v172_v16, %v183_v20  ;;  %v135_v22 = vpop.permute.xlu1 %134  ;;  %v133_v23 = vpop.permute.xlu0 %132 }
  0xa2   :  { %v141_v24 = vrot.slane %v135_v22, 4  ;;  %v140_v25 = vrot.slane %v133_v23, 4  ;;  %v1438_v26 = vcombine.high %v181_v14, %v184_v21  ;;  %v1437_v27 = vcombine.low %v181_v14, %v184_v21 }
  0xa4   :  { %v147_v28 = vsel %vm145_vm6, %v135_v22, %v141_v24  ;;  %v144_v29 = vsel %vm73_vm1, %v140_v25, %v141_v24  ;;  %962 = vmatprep.subr.bf16.mxu0 %v1438_v26 }
  0xa5   :  { %156 = vst [vmem:[#allocation2 + $0x98] sm:$0xf] %v147_v28  ;;  %v146_v30 = vsel %vm145_vm6, %v133_v23, %v144_v29  ;;  %v139_v31 = vpop.permute.xlu1 %138  ;;  %v137_v32 = vpop.permute.xlu0 %136  ;;  %963 = vmatpush1.bf16.msra.mxu0 %v1437_v27 }
  0xa6   :  { %v143_v33 = vrot.slane %v139_v31, 4  ;;  %v142_v34 = vrot.slane %v137_v32, 4 }
  0xa8   :  { %v150_v35 = vsel %vm145_vm6, %v139_v31, %v143_v33  ;;  %v148_v36 = vsel %vm73_vm1, %v142_v34, %v143_v33 }
  0xa9   :  { %158 = vst [vmem:[#allocation2 + $0xb0] sm:$0xf] %v150_v35  ;;  %v149_v37 = vsel %vm145_vm6, %v137_v32, %v148_v36  ;;  %v100_v38 = vpop.permute.xlu1 %99  ;;  %v98_v39 = vpop.permute.xlu0 %97  ;;  %v1886_v36 = vcombine.low %v1760_v10, %v1760_v10 }
  0xaa   :  { %v106_v40 = vrot.slane %v100_v38, 4  ;;  %v105_v41 = vrot.slane %v98_v39, 4  ;;  %v1432_v42 = vcombine.high %v146_v30, %v149_v37  ;;  %v1431_v43 = vcombine.low %v146_v30, %v149_v37 }
  0xac   :  { %v112_v44 = vsel %vm110_vm7, %v100_v38, %v106_v40  ;;  %v109_v45 = vsel %vm73_vm1, %v105_v41, %v106_v40  ;;  %964 = vmatprep.subr.bf16.mxu0 %v1432_v42 }
  0xad   :  { %121 = vst [vmem:[#allocation2 + $0x68] sm:$0xf] %v112_v44  ;;  %v111_v46 = vsel %vm110_vm7, %v98_v39, %v109_v45  ;;  %v104_v47 = vpop.permute.xlu1 %103  ;;  %v102_v48 = vpop.permute.xlu0 %101  ;;  %965 = vmatpush1.bf16.msra.mxu0 %v1431_v43 }
  0xae   :  { %v108_v50 = vrot.slane %v104_v47, 4  ;;  %v107_v51 = vrot.slane %v102_v48, 4 }
  0xb0   :  { %v115_v52 = vsel %vm110_vm7, %v104_v47, %v108_v50  ;;  %v113_v53 = vsel %vm73_vm1, %v107_v51, %v108_v50 }
  0xb1   :  { %123 = vst [vmem:[#allocation2 + $0x80] sm:$0xf] %v115_v52  ;;  %v114_v54 = vsel %vm110_vm7, %v102_v48, %v113_v53  ;;  %v64_v55 = vpop.permute.xlu1 %63  ;;  %v62_v56 = vpop.permute.xlu0 %61 }
  0xb2   :  { %v70_v57 = vrot.slane %v64_v55, 4  ;;  %v69_v58 = vrot.slane %v62_v56, 4  ;;  %v1426_v59 = vcombine.high %v111_v46, %v114_v54  ;;  %v1425_v60 = vcombine.low %v111_v46, %v114_v54 }
  0xb4   :  { %v77_v61 = vsel %vm75_vm8, %v64_v55, %v70_v57  ;;  %v74_v62 = vsel %vm73_vm1, %v69_v58, %v70_v57  ;;  %966 = vmatprep.subr.bf16.mxu0 %v1426_v59 }
  0xb5   :  { %86 = vst [vmem:[#allocation2 + $0x38] sm:$0xf] %v77_v61  ;;  %v76_v63 = vsel %vm75_vm8, %v62_v56, %v74_v62  ;;  %v68_v2 = vpop.permute.xlu1 %67  ;;  %v66_v3 = vpop.permute.xlu0 %65  ;;  %967 = vmatpush1.bf16.msra.mxu0 %v1425_v60  ;;  %v1524_v62 = vld [vmem:[#allocation2 + $0x158] ss:$24 sps:$4 sm:$0xff]  }
  0xb6   :  { %v72_v4 = vrot.slane %v68_v2, 4  ;;  %v71_v5 = vrot.slane %v66_v3, 4 }
  0xb8   :  { %v80_v8 = vsel %vm75_vm8, %v68_v2, %v72_v4  ;;  %v78_v9 = vsel %vm73_vm1, %v71_v5, %v72_v4 }
  0xb9   :  { %88 = vst [vmem:[#allocation2 + $0x50] sm:$0xf] %v80_v8  ;;  %v79_v12 = vsel %vm75_vm8, %v66_v3, %v78_v9  ;;  %v310_v13 = vpop.permute.xlu1 %309  ;;  %v308_v14 = vpop.permute.xlu0 %307 }
  0xba   :  { %v316_v15 = vrot.slane %v310_v13, 4  ;;  %v315_v16 = vrot.slane %v308_v14, 4  ;;  %v1420_v17 = vcombine.high %v76_v63, %v79_v12  ;;  %v1419_v18 = vcombine.low %v76_v63, %v79_v12 }
  0xbc   :  { %v322_v19 = vsel %vm320_vm9, %v310_v13, %v316_v15  ;;  %v319_v20 = vsel %vm73_vm1, %v315_v16, %v316_v15  ;;  %968 = vmatprep.subr.bf16.mxu0 %v1420_v17 }
  0xbd   :  { %331 = vst [vmem:[#allocation2 + $0x188] sm:$0xf] %v322_v19  ;;  %v321_v21 = vsel %vm320_vm9, %v308_v14, %v319_v20  ;;  %v314_v22 = vpop.permute.xlu1 %313  ;;  %v312_v23 = vpop.permute.xlu0 %311  ;;  %969 = vmatpush1.bf16.msra.mxu0 %v1419_v18 }
  0xbe   :  { %v318_v24 = vrot.slane %v314_v22, 4  ;;  %v317_v25 = vrot.slane %v312_v23, 4  ;;  %970 = vmatprep.subr.bf16.mxu0 %v1414_v6 }
  0xc0   :  { %v325_v26 = vsel %vm320_vm9, %v314_v22, %v318_v24  ;;  %v323_v27 = vsel %vm73_vm1, %v317_v25, %v318_v24  ;;  %v1531_v22 = vld [vmem:[#allocation2 + $0x128] ss:$24 sps:$4 sm:$0xff]  }
  0xc1   :  { %333 = vst [vmem:[#allocation2 + $0x1a0] sm:$0xf] %v325_v26  ;;  %v324_v28 = vsel %vm320_vm9, %v312_v23, %v323_v27  ;;  %v558_v29 = vpop.permute.xlu1 %557  ;;  %v556_v30 = vpop.permute.xlu0 %555  ;;  %971 = vmatpush1.bf16.msra.mxu0 %v1413_v7 }
  0xc2   :  { %v564_v31 = vrot.slane %v558_v29, 4  ;;  %v563_v32 = vrot.slane %v556_v30, 4  ;;  %v1462_v33 = vcombine.high %v321_v21, %v324_v28  ;;  %v1461_v34 = vcombine.low %v321_v21, %v324_v28 }
  0xc4   :  { %v569_v35 = vsel %vm285_vm2, %v558_v29, %v564_v31  ;;  %v567_v6 = vsel %vm73_vm1, %v563_v32, %v564_v31  ;;  %986 = vmatprep.subr.bf16.mxu0 %v1462_v33 }
  0xc5   :  { %578 = vst [vmem:[#allocation2 + $0x164] sm:$0xf] %v569_v35  ;;  %v568_v37 = vsel %vm285_vm2, %v556_v30, %v567_v6  ;;  %v562_v38 = vpop.permute.xlu1 %561  ;;  %v560_v39 = vpop.permute.xlu0 %559  ;;  %987 = vmatpush2.bf16.msra.mxu0 %v1461_v34 }
  0xc6   :  { %577 = vst [vmem:[#allocation2 + $0x15c] sm:$0xff] %v568_v37  ;;  %v566_v0 = vrot.slane %v562_v38, 4  ;;  %v565_v1 = vrot.slane %v560_v39, 4 }
  0xc8   :  { %v572_v7 = vsel %vm285_vm2, %v562_v38, %v566_v0  ;;  %v570_v40 = vsel %vm73_vm1, %v565_v1, %v566_v0  ;;  %989 = vmatmul.mubr.bf16.vlgmr.msra.gmra.mxu0 %v1886_v36  ;;  %v1537_v0 = vld [vmem:[#allocation2 + $0xf8] ss:$24 sps:$4 sm:$0xff]  }
  0xc9   :  { %580 = vst [vmem:[#allocation2 + $0x17c] sm:$0xf] %v572_v7  ;;  %v571_v41 = vsel %vm285_vm2, %v560_v39, %v570_v40  ;;  %v524_v10 = vpop.permute.xlu1 %523  ;;  %v522_v42 = vpop.permute.xlu0 %521  ;;  %1469 = vmatprep.mubr.msk.bf16.mxu0 %vm952_vm0, %v1764_v11  ;;  %vm1232_vm0 = vcmask 9216   ;;  %vm1242_vm2 = vcmask 1041408  }
  0xca   :  { %579 = vst [vmem:[#allocation2 + $0x174] sm:$0xff] %v571_v41  ;;  %v530_v43 = vrot.slane %v524_v10, 4  ;;  %v529_v44 = vrot.slane %v522_v42, 4 }
  0xcc   :  { %v535_v45 = vsel %vm250_vm3, %v524_v10, %v530_v43  ;;  %v533_v46 = vsel %vm73_vm1, %v529_v44, %v530_v43 }
  0xcd   :  { %544 = vst [vmem:[#allocation2 + $0x134] sm:$0xf] %v535_v45  ;;  %v534_v47 = vsel %vm250_vm3, %v522_v42, %v533_v46  ;;  %v528_v48 = vpop.permute.xlu1 %527  ;;  %v526_v50 = vpop.permute.xlu0 %525 }
  0xce   :  { %543 = vst [vmem:[#allocation2 + $0x12c] sm:$0xff] %v534_v47  ;;  %v532_v51 = vrot.slane %v528_v48, 4  ;;  %v531_v52 = vrot.slane %v526_v50, 4 }
  0xd0   :  { %v538_v53 = vsel %vm250_vm3, %v528_v48, %v532_v51  ;;  %v536_v54 = vsel %vm73_vm1, %v531_v52, %v532_v51  ;;  %v1523_v61 = vld [vmem:[#allocation2 + $0x164] ss:$24 sps:$4 sm:$0xff]  }
  0xd1   :  { %546 = vst [vmem:[#allocation2 + $0x14c] sm:$0xf] %v538_v53  ;;  %v537_v11 = vsel %vm250_vm3, %v526_v50, %v536_v54  ;;  %v490_v55 = vpop.permute.xlu1 %489  ;;  %v488_v56 = vpop.permute.xlu0 %487  ;;  %v1519_v57 = vld [vmem:[#allocation2 + $0x15c] ss:$24 sps:$4 sm:$0xff]   ;;  %v1521_v60 = vld [vmem:[#allocation2 + $0x160] ss:$24 sps:$4 sm:$0xff]   ;;  %1038 = vmatprep.subr.bf16.mxu0 %v1523_v61 }
  0xd2   :  { %545 = vst [vmem:[#allocation2 + $0x144] sm:$0xff] %v537_v11  ;;  %v496_v58 = vrot.slane %v490_v55, 4  ;;  %v495_v59 = vrot.slane %v488_v56, 4  ;;  %997 = vmatprep.subr.bf16.mxu1 %v1519_v57  ;;  %1039 = vmatpush1.bf16.msra.mxu0 %v1521_v60  ;;  %v1543_v11 = vld [vmem:[#allocation2 + $0xc8] ss:$24 sps:$4 sm:$0xff]   ;;  %vm1238_vm3 = vcmask 15360  }
  0xd3   :  { %998 = vmatpush1.bf16.msra.mxu1 %v1524_v62 }
  0xd4   :  { %v501_v63 = vsel %vm215_vm4, %v490_v55, %v496_v58  ;;  %v499_v2 = vsel %vm73_vm1, %v495_v59, %v496_v58 }
  0xd5   :  { %510 = vst [vmem:[#allocation2 + $0x104] sm:$0xf] %v501_v63  ;;  %v500_v3 = vsel %vm215_vm4, %v488_v56, %v499_v2  ;;  %v494_v4 = vpop.permute.xlu1 %493  ;;  %v492_v5 = vpop.permute.xlu0 %491 }
  0xd6   :  { %509 = vst [vmem:[#allocation2 + $0xfc] sm:$0xff] %v500_v3  ;;  %v498_v8 = vrot.slane %v494_v4, 4  ;;  %v497_v9 = vrot.slane %v492_v5, 4 }
  0xd8   :  { %v504_v12 = vsel %vm215_vm4, %v494_v4, %v498_v8  ;;  %v502_v13 = vsel %vm73_vm1, %v497_v9, %v498_v8  ;;  %v1530_v21 = vld [vmem:[#allocation2 + $0x134] ss:$24 sps:$4 sm:$0xff]  }
  0xd9   :  { %512 = vst [vmem:[#allocation2 + $0x11c] sm:$0xf] %v504_v12  ;;  %v503_v14 = vsel %vm215_vm4, %v492_v5, %v502_v13  ;;  %v456_v15 = vpop.permute.xlu1 %455  ;;  %v454_v16 = vpop.permute.xlu0 %453  ;;  %v1526_v17 = vld [vmem:[#allocation2 + $0x12c] ss:$24 sps:$4 sm:$0xff]   ;;  %v1528_v20 = vld [vmem:[#allocation2 + $0x130] ss:$24 sps:$4 sm:$0xff]   ;;  %1040 = vmatprep.subr.bf16.mxu0 %v1530_v21 }
  0xda   :  { %511 = vst [vmem:[#allocation2 + $0x114] sm:$0xff] %v503_v14  ;;  %v462_v18 = vrot.slane %v456_v15, 4  ;;  %v461_v19 = vrot.slane %v454_v16, 4  ;;  %999 = vmatprep.subr.bf16.mxu1 %v1526_v17  ;;  %1041 = vmatpush1.bf16.msra.mxu0 %v1528_v20  ;;  %v1549_v14 = vld [vmem:[#allocation2 + $0x98] ss:$24 sps:$4 sm:$0xff]  }
  0xdb   :  { %1000 = vmatpush1.bf16.msra.mxu1 %v1531_v22 }
  0xdc   :  { %v467_v23 = vsel %vm180_vm5, %v456_v15, %v462_v18  ;;  %v465_v24 = vsel %vm73_vm1, %v461_v19, %v462_v18 }
  0xdd   :  { %476 = vst [vmem:[#allocation2 + $0xd4] sm:$0xf] %v467_v23  ;;  %v466_v25 = vsel %vm180_vm5, %v454_v16, %v465_v24  ;;  %v460_v26 = vpop.permute.xlu1 %459  ;;  %v458_v27 = vpop.permute.xlu0 %457 }
  0xde   :  { %475 = vst [vmem:[#allocation2 + $0xcc] sm:$0xff] %v466_v25  ;;  %v464_v28 = vrot.slane %v460_v26, 4  ;;  %v463_v29 = vrot.slane %v458_v27, 4 }
  0xe0   :  { %v470_v30 = vsel %vm180_vm5, %v460_v26, %v464_v28  ;;  %v468_v31 = vsel %vm73_vm1, %v463_v29, %v464_v28  ;;  %v1536_v39 = vld [vmem:[#allocation2 + $0x104] ss:$24 sps:$4 sm:$0xff]  }
  0xe1   :  { %478 = vst [vmem:[#allocation2 + $0xec] sm:$0xf] %v470_v30  ;;  %v469_v32 = vsel %vm180_vm5, %v458_v27, %v468_v31  ;;  %v422_v33 = vpop.permute.xlu1 %421  ;;  %v420_v34 = vpop.permute.xlu0 %419  ;;  %v1532_v35 = vld [vmem:[#allocation2 + $0xfc] ss:$24 sps:$4 sm:$0xff]   ;;  %v1534_v38 = vld [vmem:[#allocation2 + $0x100] ss:$24 sps:$4 sm:$0xff]   ;;  %1042 = vmatprep.subr.bf16.mxu0 %v1536_v39 }
  0xe2   :  { %477 = vst [vmem:[#allocation2 + $0xe4] sm:$0xff] %v469_v32  ;;  %v428_v6 = vrot.slane %v422_v33, 4  ;;  %v427_v37 = vrot.slane %v420_v34, 4  ;;  %1001 = vmatprep.subr.bf16.mxu1 %v1532_v35  ;;  %1043 = vmatpush1.bf16.msra.mxu0 %v1534_v38  ;;  %v1555_v32 = vld [vmem:[#allocation2 + $0x68] ss:$24 sps:$4 sm:$0xff]  }
  0xe3   :  { %1002 = vmatpush1.bf16.msra.mxu1 %v1537_v0 }
  0xe4   :  { %v433_v1 = vsel %vm145_vm6, %v422_v33, %v428_v6  ;;  %v431_v7 = vsel %vm73_vm1, %v427_v37, %v428_v6 }
  0xe5   :  { %442 = vst [vmem:[#allocation2 + $0xa4] sm:$0xf] %v433_v1  ;;  %v432_v40 = vsel %vm145_vm6, %v420_v34, %v431_v7  ;;  %v426_v41 = vpop.permute.xlu1 %425  ;;  %v424_v10 = vpop.permute.xlu0 %423  ;;  %v1562_v7 = vld [vmem:[#allocation2 + $0xc] ss:$24 sps:$4 sm:$0xff]  }
  0xe6   :  { %441 = vst [vmem:[#allocation2 + $0x9c] sm:$0xff] %v432_v40  ;;  %v430_v42 = vrot.slane %v426_v41, 4  ;;  %v429_v43 = vrot.slane %v424_v10, 4  ;;  %v1566_v40 = vld [vmem:[#allocation2 + $0x14] ss:$24 sps:$4 sm:$0xff]  }
  0xe8   :  { %v436_v44 = vsel %vm145_vm6, %v426_v41, %v430_v42  ;;  %v434_v45 = vsel %vm73_vm1, %v429_v43, %v430_v42  ;;  %v1542_v54 = vld [vmem:[#allocation2 + $0xd4] ss:$24 sps:$4 sm:$0xff]  }
  0xe9   :  { %444 = vst [vmem:[#allocation2 + $0xbc] sm:$0xf] %v436_v44  ;;  %v435_v46 = vsel %vm145_vm6, %v424_v10, %v434_v45  ;;  %v388_v47 = vpop.permute.xlu1 %387  ;;  %v386_v48 = vpop.permute.xlu0 %385  ;;  %v1538_v50 = vld [vmem:[#allocation2 + $0xcc] ss:$24 sps:$4 sm:$0xff]   ;;  %v1540_v53 = vld [vmem:[#allocation2 + $0xd0] ss:$24 sps:$4 sm:$0xff]   ;;  %1044 = vmatprep.subr.bf16.mxu0 %v1542_v54 }
  0xea   :  { %443 = vst [vmem:[#allocation2 + $0xb4] sm:$0xff] %v435_v46  ;;  %v394_v51 = vrot.slane %v388_v47, 4  ;;  %v393_v52 = vrot.slane %v386_v48, 4  ;;  %1003 = vmatprep.subr.bf16.mxu1 %v1538_v50  ;;  %1045 = vmatpush1.bf16.msra.mxu0 %v1540_v53  ;;  %v1561_v44 = vld [vmem:[#allocation2 + $0x38] ss:$24 sps:$4 sm:$0xff]  }
  0xeb   :  { %1004 = vmatpush1.bf16.msra.mxu1 %v1543_v11  ;;  %v1567_v45 = vld [vmem:[#allocation2 + $0x8] ss:$24 sps:$4 sm:$0xff]  }
  0xec   :  { %v399_v55 = vsel %vm110_vm7, %v388_v47, %v394_v51  ;;  %v397_v56 = vsel %vm73_vm1, %v393_v52, %v394_v51  ;;  %v1564_v46 = vld [vmem:[#allocation2 + $0x10] ss:$24 sps:$4 sm:$0xff]  }
  0xed   :  { %408 = vst [vmem:[#allocation2 + $0x74] sm:$0xf] %v399_v55  ;;  %v398_v57 = vsel %vm110_vm7, %v386_v48, %v397_v56  ;;  %v392_v58 = vpop.permute.xlu1 %391  ;;  %v390_v59 = vpop.permute.xlu0 %389  ;;  %v1573_v51 = vld [vmem:[#allocation2 + $0x188] ss:$24 sps:$4 sm:$0xff]   ;;  %v1081_v55 = vlaneseq }
  0xee   :  { %407 = vst [vmem:[#allocation2 + $0x6c] sm:$0xff] %v398_v57  ;;  %v396_v60 = vrot.slane %v392_v58, 4  ;;  %v395_v61 = vrot.slane %v390_v59, 4 }
  0xef   :  { %v1082_v56 = vshrl.u32 %v1081_v55, 7 }
  0xf0   :  { %v402_v62 = vsel %vm110_vm7, %v392_v58, %v396_v60  ;;  %v400_v63 = vsel %vm73_vm1, %v395_v61, %v396_v60  ;;  %v1548_v13 = vld [vmem:[#allocation2 + $0xa4] ss:$24 sps:$4 sm:$0xff]  }
  0xf1   :  { %410 = vst [vmem:[#allocation2 + $0x8c] sm:$0xf] %v402_v62  ;;  %v401_v2 = vsel %vm110_vm7, %v390_v59, %v400_v63  ;;  %v354_v3 = vpop.permute.xlu1 %353  ;;  %v352_v4 = vpop.permute.xlu0 %351  ;;  %v1544_v5 = vld [vmem:[#allocation2 + $0x9c] ss:$24 sps:$4 sm:$0xff]   ;;  %v1546_v12 = vld [vmem:[#allocation2 + $0xa0] ss:$24 sps:$4 sm:$0xff]   ;;  %1046 = vmatprep.subr.bf16.mxu0 %v1548_v13 }
  0xf2   :  { %409 = vst [vmem:[#allocation2 + $0x84] sm:$0xff] %v401_v2  ;;  %v360_v8 = vrot.slane %v354_v3, 4  ;;  %v359_v9 = vrot.slane %v352_v4, 4  ;;  %1005 = vmatprep.subr.bf16.mxu1 %v1544_v5  ;;  %1047 = vmatpush1.bf16.msra.mxu0 %v1546_v12  ;;  %v1083_v57 = vsub.s32 0, %v1082_v56  ;;  %v1087_v58 = vsub.s32 1, %v1082_v56 }
  0xf3   :  { %1006 = vmatpush1.bf16.msra.mxu1 %v1549_v14  ;;  %v1079_v60 = vld [vmem:[%s1989_s5] sm:$0x3f] }
  0xf4   :  { %v365_v15 = vsel %vm75_vm8, %v354_v3, %v360_v8  ;;  %v363_v16 = vsel %vm73_vm1, %v359_v9, %v360_v8  ;;  %v1084_v63 = vrot.slane %v1079_v60, %v1083_v57  ;;  %v1088_v2 = vrot.slane %v1079_v60, %v1087_v58 }
  0xf5   :  { %374 = vst [vmem:[#allocation2 + $0x44] sm:$0xf] %v365_v15  ;;  %v364_v17 = vsel %vm75_vm8, %v352_v4, %v363_v16  ;;  %v358_v18 = vpop.permute.xlu1 %357  ;;  %v356_v19 = vpop.permute.xlu0 %355  ;;  %v1099_v3 = vsub.s32 4, %v1082_v56  ;;  %v1095_v4 = vsub.s32 3, %v1082_v56  ;;  %v1103_v9 = vsub.s32 5, %v1082_v56 }
  0xf6   :  { %373 = vst [vmem:[#allocation2 + $0x3c] sm:$0xff] %v364_v17  ;;  %v362_v20 = vrot.slane %v358_v18, 4  ;;  %v361_v21 = vrot.slane %v356_v19, 4 }
  0xf7   :  { %v1100_v14 = vrot.slane %v1079_v60, %v1099_v3  ;;  %v1096_v17 = vrot.slane %v1079_v60, %v1095_v4  ;;  %v1317_v3 = vld [vmem:[%s1988_s4] sm:$0xff]  ;;  %s1639_s4 = smov [#allocation8]  }
  0xf8   :  { %v368_v22 = vsel %vm75_vm8, %v358_v18, %v362_v20  ;;  %v366_v23 = vsel %vm73_vm1, %v361_v21, %v362_v20  ;;  %v1554_v31 = vld [vmem:[#allocation2 + $0x74] ss:$24 sps:$4 sm:$0xff]  }
  0xf9   :  { %376 = vst [vmem:[#allocation2 + $0x5c] sm:$0xf] %v368_v22  ;;  %v367_v24 = vsel %vm75_vm8, %v356_v19, %v366_v23  ;;  %v592_v25 = vpop.permute.xlu1 %591  ;;  %v590_v26 = vpop.permute.xlu0 %589  ;;  %v1550_v27 = vld [vmem:[#allocation2 + $0x6c] ss:$24 sps:$4 sm:$0xff]   ;;  %v1552_v30 = vld [vmem:[#allocation2 + $0x70] ss:$24 sps:$4 sm:$0xff]   ;;  %1048 = vmatprep.subr.bf16.mxu0 %v1554_v31  ;;  %v1104_v22 = vrot.slane %v1079_v60, %v1103_v9 }
  0xfa   :  { %375 = vst [vmem:[#allocation2 + $0x54] sm:$0xff] %v367_v24  ;;  %v598_v28 = vrot.slane %v592_v25, 4  ;;  %v597_v29 = vrot.slane %v590_v26, 4  ;;  %1007 = vmatprep.subr.bf16.mxu1 %v1550_v27  ;;  %1049 = vmatpush1.bf16.msra.mxu0 %v1552_v30 }
  0xfb   :  { %1008 = vmatpush1.bf16.msra.mxu1 %v1555_v32 }
  0xfc   :  { %v603_v33 = vsel %vm320_vm9, %v592_v25, %v598_v28  ;;  %v601_v34 = vsel %vm73_vm1, %v597_v29, %v598_v28 }
  0xfd   :  { %612 = vst [vmem:[#allocation2 + $0x194] sm:$0xf] %v603_v33  ;;  %v602_v35 = vsel %vm320_vm9, %v590_v26, %v601_v34  ;;  %v596_v6 = vpop.permute.xlu1 %595  ;;  %v594_v37 = vpop.permute.xlu0 %593 }
  0xfe   :  { %611 = vst [vmem:[#allocation2 + $0x18c] sm:$0xff] %v602_v35  ;;  %v600_v38 = vrot.slane %v596_v6, 4  ;;  %v599_v39 = vrot.slane %v594_v37, 4 }
 0x100   :  { %v606_v0 = vsel %vm320_vm9, %v596_v6, %v600_v38  ;;  %v604_v1 = vsel %vm73_vm1, %v599_v39, %v600_v38  ;;  %v1560_v43 = vld [vmem:[#allocation2 + $0x44] ss:$24 sps:$4 sm:$0xff]   ;;  %vm1234_vm1 = vcmask 25616  }
 0x101   :  { %614 = vst [vmem:[#allocation2 + $0x1ac] sm:$0xf] %v606_v0  ;;  %v605_v41 = vsel %vm320_vm9, %v594_v37, %v604_v1  ;;  %v1556_v10 = vld [vmem:[#allocation2 + $0x3c] ss:$24 sps:$4 sm:$0xff]   ;;  %v1558_v42 = vld [vmem:[#allocation2 + $0x40] ss:$24 sps:$4 sm:$0xff]   ;;  %1050 = vmatprep.subr.bf16.mxu0 %v1560_v43 }
 0x102   :  { %613 = vst [vmem:[#allocation2 + $0x1a4] sm:$0xff] %v605_v41  ;;  %1009 = vmatprep.subr.bf16.mxu1 %v1556_v10  ;;  %1051 = vmatpush1.bf16.msra.mxu0 %v1558_v42  ;;  %v1632_v42 = vmov 0.0  }
 0x103   :  { %1010 = vmatpush1.bf16.msra.mxu1 %v1561_v44  ;;  %1052 = vmatprep.subr.bf16.mxu0 %v1566_v40 }
 0x104   :  { %1011 = vmatprep.subr.bf16.mxu1 %v1562_v7 }
 0x106   :  { %1053 = vmatpush1.bf16.msra.mxu0 %v1564_v46 }
 0x107   :  { %1012 = vmatpush1.bf16.msra.mxu1 %v1567_v45 }
 0x108   :  { %v1572_v50 = vld [vmem:[#allocation2 + $0x194] ss:$24 sps:$4 sm:$0xff]  }
 0x109   :  { %v1568_v47 = vld [vmem:[#allocation2 + $0x18c] ss:$24 sps:$4 sm:$0xff]   ;;  %v1570_v48 = vld [vmem:[#allocation2 + $0x190] ss:$24 sps:$4 sm:$0xff]   ;;  %1068 = vmatprep.subr.bf16.mxu0 %v1572_v50 }
 0x10a   :  { %1027 = vmatprep.subr.bf16.mxu1 %v1568_v47  ;;  %1069 = vmatpush2.bf16.msra.mxu0 %v1570_v48  ;;  %v674_v59 = vpop.permute.xlu0 %673  ;;  %v1147_v47 = vld [vmem:[%s1990_s6] sm:$0x3]  ;;  %s1635_s6 = smov 3  }
 0x10b   :  { %1028 = vmatpush2.bf16.msra.mxu1 %v1573_v51 }
 0x10c   :  { %1477 = vmatprep.subr.mxu1 %v1632_v42 }
 0x10d   :  { %1071 = vmatmul.mubr.bf16.vlgmr.msra.gmra.mxu0 %v1886_v36 }
 0x10e   :  { %1030 = vmatmul.mubr.bf16.vlgmr.msra.gmra.mxu1 %v1886_v36  ;;  %v1091_v36 = vsub.s32 2, %v1082_v56 }
 0x10f   :  { %1479 = vmatprep.mubr.msk.f32.mxu1 %vm1633_vm10, %v1632_v42 }
 0x110   :  { %v1092_v12 = vrot.slane %v1079_v60, %v1091_v36 }
 0x188   :  { %v990_v52 = vpop.f32.mrf.mxu0 }
 0x189   :  { %v1942_v61 = vadd.f32 %v990_v52, %v674_v59 }
 0x18a   :  { %v992_v53 = vpop.f32.mrf.mxu0 }
 0x18b   :  { %v1944_v62 = vadd.f32 %v992_v53, %v674_v59  ;;  %v1111_v5 = vmul.f32 %v1084_v63, %v1942_v61 }
 0x18c   :  { %v994_v54 = vpop.f32.mrf.mxu0 }
 0x18d   :  { %v1112_v8 = vmul.f32 %v1088_v2, %v1944_v62  ;;  %v1123_v18 = vmul.f32 %v1111_v5, %v1111_v5  ;;  %v1316_v54 = vld [vmem:[%s1987_s3] sm:$0xff] }
 0x18e   :  { %v995_v11 = vpop.f32.mrf.mxu0 }
 0x18f   :  { %v1124_v19 = vmul.f32 %v1112_v8, %v1112_v8  ;;  %v1117_v26 = vadd.f32 %v1112_v8, %v1111_v5  ;;  %v1636_v11 = vmov 1   ;;  %v1637_v5 = vmov 2  }
 0x190   :  { %1511 = vset.pattern.permute.xlu0 %v1636_v11 }
 0x191   :  { %v1126_v34 = vadd.f32 %v1124_v19, %v1123_v18 }
 0x1cd   :  { %v1072_v16 = vpop.f32.mrf.mxu0 }
 0x1ce   :  { %v1031_v13 = vpop.f32.mrf.mxu1  ;;  %v1950_v20 = vadd.f32 %v1072_v16, %v674_v59 }
 0x1cf   :  { %v1948_v15 = vadd.f32 %v1031_v13, %v674_v59  ;;  %v1074_v25 = vpop.f32.mrf.mxu0 }
 0x1d0   :  { %v1033_v21 = vpop.f32.mrf.mxu1  ;;  %v1115_v27 = vmul.f32 %v1100_v14, %v1950_v20  ;;  %v1956_v28 = vadd.f32 %v1074_v25, %v674_v59 }
 0x1d1   :  { %v1113_v23 = vmul.f32 %v1092_v12, %v1948_v15  ;;  %v1953_v24 = vadd.f32 %v1033_v21, %v674_v59  ;;  %v1076_v31 = vpop.f32.mrf.mxu0  ;;  %v1236_v59 = vld [vmem:[%s1991_s7] sm:$0xff]  ;;  %v1638_v12 = vmov 3   ;;  %s1399_s7 = sshll.u32 %s1639_s4, 4  ;;  %s1400_s7 = int_to_ptr.vmem [resolvable:$true] %s1399_s7 }
 0x1d2   :  { %v1035_v29 = vpop.f32.mrf.mxu1  ;;  %v1116_v35 = vmul.f32 %v1104_v22, %v1956_v28  ;;  %v1139_v37 = vmul.f32 %v1115_v27, %v1115_v27  ;;  %s1596_s30 = scalar_lea.vmem %s1400_s7, 768  ;;  %p1601_p6 = scmp.lt.s32.totalorder %s1400_s7, %s1400_s7 }
 0x1d3   :  { %v1114_v30 = vmul.f32 %v1096_v17, %v1953_v24  ;;  %v1118_v32 = vadd.f32 %v1117_v26, %v1113_v23  ;;  %v1125_v33 = vmul.f32 %v1113_v23, %v1113_v23  ;;  %v1077_v39 = vpop.f32.mrf.mxu0  ;;  %p1597_p5 = scmp.ne.s32.totalorder %s1400_s7, %s1596_s30  ;;  %p1602_p7 = scmp.lt.s32.totalorder %s1596_s30, %s1596_s30 }
 0x1d4   :  { %v1036_v6 = vpop.f32.mrf.mxu1  ;;  %v1140_v40 = vmul.f32 %v1116_v35, %v1116_v35 }
 0x1d5   :  { %v1138_v38 = vmul.f32 %v1114_v30, %v1114_v30  ;;  %1119 = vadd.xlane.f32.xlu1 %v1118_v32  ;;  %v1127_v0 = vadd.f32 %v1126_v34, %v1125_v33  ;;  %v1132_v1 = vadd.f32 %v1115_v27, %v1114_v30  ;;  %p1603_p8 = por %p1602_p7, %p1601_p6 }
 0x1d7   :  { %1128 = vadd.xlane.f32.xlu0 %v1127_v0  ;;  %v1133_v7 = vadd.f32 %v1132_v1, %v1116_v35  ;;  %v1141_v41 = vadd.f32 %v1139_v37, %v1138_v38  ;;  %p1604_p9 = pnand %p1603_p8, %p1597_p5 }
 0x1d9   :  { %1134 = vadd.xlane.f32.xlu1 %v1133_v7  ;;  %v1142_v10 = vadd.f32 %v1141_v41, %v1140_v40 }
 0x1db   :  { %1143 = vadd.xlane.f32.xlu0 %v1142_v10 }
 0x1f1   :  { %1327 = vrot.lane.b32.xlu0 %v1316_v54, %s1634_s24 }
 0x25e   :  { %v1120_v43 = vpop.xlane.xlu1 %1119 }
 0x25f   :  { %1122 = vst.msk [vmem:[#allocation3] sm:$0xff] %vm1121_vm11, %v1120_v43 }
 0x260   :  { %v1129_v44 = vpop.xlane.xlu0 %1128 }
 0x261   :  { %1131 = vst.msk [vmem:[#allocation3] sm:$0xff] %vm1130_vm12, %v1129_v44 }
 0x262   :  { %v1135_v45 = vpop.xlane.xlu1 %1134 }
 0x263   :  { %1137 = vst.msk [vmem:[#allocation3] sm:$0xff] %vm1136_vm13, %v1135_v45 }
 0x264   :  { %v1144_v46 = vpop.xlane.xlu0 %1143 }
 0x265   :  { %1146 = vst.msk [vmem:[#allocation3] sm:$0xff] %vm1145_vm14, %v1144_v46 }
 0x268   :  { %v1328_v2 = vpop.permute.xlu0 %1327 }
 0x26c   :  { %v1148_v48 = vld [vmem:[#allocation3] sm:$0xff] }
 0x26d   :  { %1478 = vmatpush3.msra.mxu1 %v1148_v48 }
 0x26e   :  { %1480 = vmatmul.mubr.msk.f32.vlgmr.msra.gmra.mxu1 %vm1149_vm15, %v1147_v47  ;;  %1482 = vmatprep.subr.mxu1 %v1632_v42 }
 0x26f   :  { %1484 = vmatprep.mubr.msk.f32.mxu1 %vm1633_vm10, %v1632_v42 }
 0x32e   :  { %v1219_v50 = vpop.f32.mrf.mxu1 }
 0x32f   :  { %v1223_v51 = vmul.f32 0.0009765625, %v1219_v50 }
 0x330   :  { %v1481_v52 = vpop.f32.mrf.mxu1 }
 0x331   :  { %1233 = vst.msk [vmem:[#allocation4] sm:$0x3] %vm1232_vm0, %v1223_v51  ;;  %v1224_v53 = vmul.f32 %v1223_v51, %v1223_v51 }
 0x333   :  { %1226 = vrot.lane.b32.xlu1 %v1224_v53, %s1634_s24 }
 0x337   :  { %1366 = vrot.lane.b32.xlu1 %v1316_v54, %s1635_s6 }
 0x3a5   :  { %v1227_v55 = vpop.permute.xlu1 %1226 }
 0x3a6   :  { %v1229_v56 = vsub.f32 %v1223_v51, %v1227_v55 }
 0x3a8   :  { %v1230_v57 = vadd.f32 1e-05, %v1229_v56 }
 0x3a9   :  { %v1367_v8 = vpop.permute.xlu1 %1366 }
 0x3aa   :  { %1574 = vrsqrt.f32 %v1230_v57 }
 0x3b7   :  { %v1575_v58 = vpop.eup %1574 }
 0x3b8   :  { %1235 = vst.msk [vmem:[#allocation4] sm:$0x3] %vm1234_vm1, %v1575_v58 }
 0x3bf   :  { %v1237_v60 = vld [vmem:[#allocation4] sm:$0x3] }
 0x3c0   :  { %1483 = vmatpush3.msk.msra.mxu1 %vm1242_vm2, %v1237_v60 }
 0x3c1   :  { %1485 = vmatmul.mubr.msk.f32.vlgmr.msra.gmra.mxu1 %vm1238_vm3, %v1236_v59 }
 0x481   :  { %v1312_v63 = vpop.f32.mrf.mxu1 }
 0x482   :  { %1360 = vperm.xlu0 %1511, %v1312_v63   ;;  %1320 = vperm.xlu1 %1510, %v1312_v63   ;;  %v1330_v4 = vmul.f32 %v1328_v2, %v1312_v63  ;;  %v1369_v9 = vmul.f32 %v1367_v8, %v1312_v63 }
 0x483   :  { %v1486_v36 = vpop.f32.mrf.mxu1 }
 0x486   :  { %1512 = vset.pattern.permute.xlu1 %v1637_v5  ;;  %1514 = vset.pattern.permute.xlu0 %v1631_v49 }
 0x487   :  { %1333 = vperm.xlu1 %1512, %v1330_v4   ;;  %1341 = vperm.xlu0 %1514, %v1317_v3  }
 0x48b   :  { %1513 = vset.pattern.permute.xlu1 %v1638_v12  ;;  %1515 = vset.pattern.permute.xlu0 %v1638_v12 }
 0x48c   :  { %1372 = vperm.xlu1 %1513, %v1369_v9  }
 0x4fd   :  { %v1321_v13 = vpop.permute.xlu1 %1320  ;;  %v1361_v14 = vpop.permute.xlu0 %1360 }
 0x4fe   :  { %v1323_v16 = vsub.f32 %v1942_v61, %v1321_v13  ;;  %v1324_v17 = vsub.f32 %v1944_v62, %v1321_v13  ;;  %v1325_v18 = vsub.f32 %v1948_v15, %v1321_v13  ;;  %v1363_v29 = vsub.f32 %v1953_v24, %v1361_v14 }
 0x4ff   :  { %v1364_v30 = vsub.f32 %v1950_v20, %v1361_v14  ;;  %v1365_v31 = vsub.f32 %v1956_v28, %v1361_v14 }
 0x502   :  { %v1334_v19 = vpop.permute.xlu1 %1333  ;;  %v1342_v21 = vpop.permute.xlu0 %1341 }
 0x503   :  { %v1336_v22 = vmul.f32 %v1334_v19, %v1323_v16  ;;  %v1337_v49 = vmul.f32 %v1334_v19, %v1324_v17  ;;  %v1338_v23 = vmul.f32 %v1334_v19, %v1325_v18 }
 0x505   :  { %v1344_v25 = vadd.f32 %v1342_v21, %v1336_v22  ;;  %v1345_v26 = vadd.f32 %v1342_v21, %v1337_v49  ;;  %v1346_v27 = vadd.f32 %v1342_v21, %v1338_v23 }
 0x507   :  { %vm1347_vm4 = vcmp.gt.f32.partialorder %v1344_v25, 0.0  ;;  %vm1348_vm5 = vcmp.gt.f32.partialorder %v1345_v26, 0.0  ;;  %vm1349_vm6 = vcmp.gt.f32.partialorder %v1346_v27, 0.0  ;;  %v1350_v61 = vmul.f32 0.2, %v1344_v25  ;;  %v1373_v62 = vpop.permute.xlu1 %1372 }
 0x508   :  { %v1351_v15 = vmul.f32 0.2, %v1345_v26  ;;  %v1352_v32 = vmul.f32 0.2, %v1346_v27  ;;  %v1375_v33 = vmul.f32 %v1373_v62, %v1363_v29  ;;  %v1376_v34 = vmul.f32 %v1373_v62, %v1364_v30 }
 0x509   :  { %v1353_v35 = vsel %vm1347_vm4, %v1344_v25, %v1350_v61  ;;  %v1377_v6 = vmul.f32 %v1373_v62, %v1365_v31 }
 0x50a   :  { %v1354_v37 = vsel %vm1348_vm5, %v1345_v26, %v1351_v15  ;;  %v1355_v38 = vsel %vm1349_vm6, %v1346_v27, %v1352_v32  ;;  %1356 = vst [vmem:[#allocation8] sm:$0xff] %v1353_v35  ;;  %v1378_v39 = vadd.f32 %v1375_v33, %v1342_v21  ;;  %v1379_v24 = vadd.f32 %v1376_v34, %v1342_v21 }
 0x50b   :  { %1357 = vst [vmem:[#allocation8 + $0x8] sm:$0xff] %v1354_v37  ;;  %1358 = vst [vmem:[#allocation8 + $0x10] sm:$0xff] %v1355_v38  ;;  %v1380_v20 = vadd.f32 %v1377_v6, %v1342_v21 }
 0x50c   :  { %vm1381_vm7 = vcmp.gt.f32.partialorder %v1378_v39, 0.0  ;;  %vm1382_vm8 = vcmp.gt.f32.partialorder %v1379_v24, 0.0  ;;  %v1384_v28 = vmul.f32 0.2, %v1378_v39  ;;  %v1385_v0 = vmul.f32 0.2, %v1379_v24 }
 0x50d   :  { %vm1383_vm9 = vcmp.gt.f32.partialorder %v1380_v20, 0.0  ;;  %v1386_v1 = vmul.f32 0.2, %v1380_v20 }
 0x50e   :  { %v1387_v7 = vsel %vm1381_vm7, %v1378_v39, %v1384_v28  ;;  %v1388_v40 = vsel %vm1382_vm8, %v1379_v24, %v1385_v0 }
 0x50f   :  { %v1389_v41 = vsel %vm1383_vm9, %v1380_v20, %v1386_v1  ;;  %1391 = vst [vmem:[#allocation8 + $0x18] sm:$0xff] %v1387_v7  ;;  %1392 = vst [vmem:[#allocation8 + $0x20] sm:$0xff] %v1388_v40 }
 0x510   :  { %1393 = vst [vmem:[#allocation8 + $0x28] sm:$0xff] %v1389_v41 }
 0x511   :  { %1607 = shalt.err (!%p1604_p9)
}
 0x512   :  { %s1640_s9 = smov 384   ;;  %s1641_s10 = smov 24  }
 0x513   :  { %1405 = dma.vmem_to_hbm [thread:$0]  %s1400_s7, 768, %s1992_s8, [#allocation7], %s1640_s9, %s1640_s9, %s1641_s10  }
 0x514   :  { %1618 = dma.done.wait [#allocation7], 768  }
 0x515   :  { %1619 = vsyncadd [#allocation7], 4294966528 }
 0x516   :  { %1409 = vsyncpa [#allocation6], 1 }
 0x517   :  { %1410 = vsyncpa [#allocation7], 1 }

</bundles_post_ra>
